<compile_context>
chip_gen: v6e
topology: v6e:2x2x1
jax: 0.10.0
libtpu: 0.0.40
codegen_flags: <defaults>
</compile_context>

<pallas_src>
import jax
import jax.numpy as jnp
from jax.experimental import pallas as pl
from jax.experimental.pallas import tpu as pltpu

C_IN, C1, C2, C3, C4 = 4, 64, 64, 128, 1024
F1, F2, F3 = 256, 64, 8
BN_EPS = 1e-5


# ---------------------------------------------------------------------------
# Kernel 1: conv1..conv4 (1x1 conv + folded BN + ReLU) -> running max over the
# length axis (MaxPool1d over the whole length).  conv4's shift + ReLU are
# applied once on the pooled (1, C4) vector at the last reduction step.
# ---------------------------------------------------------------------------
def _conv_pool_kernel(x_ref,
                      w1, t1, w2, t2, w3, t3, w4, t4,
                      pooled_ref, acc_ref):
    t = pl.program_id(1)

    @pl.when(t == 0)
    def _():
        # Accumulating the RAW conv4 matmul output (shift/ReLU hoisted past
        # the max), so the running max must start at -inf, not 0.
        acc_ref[...] = jnp.full(acc_ref.shape, -jnp.inf, acc_ref.dtype)

    # Conv stack on a (tile, C_IN) slab; bf16 matmul operands, f32 accumulate.
    x = x_ref[0]                                                     # (tile, C_IN) bf16
    h = jnp.maximum(jnp.dot(x, w1[...],
                            preferred_element_type=jnp.float32) + t1[...], 0.0)
    h = jnp.maximum(jnp.dot(h.astype(jnp.bfloat16), w2[...],
                            preferred_element_type=jnp.float32) + t2[...], 0.0)
    h = jnp.maximum(jnp.dot(h.astype(jnp.bfloat16), w3[...],
                            preferred_element_type=jnp.float32) + t3[...], 0.0)
    # conv4: raw matmul only — the per-channel shift and ReLU are monotone, so
    # they commute with the max-pool and are applied once after pooling.
    z4 = jnp.dot(h.astype(jnp.bfloat16), w4[...],
                 preferred_element_type=jnp.float32)                 # (tile, C4) f32
    acc_ref[...] = jnp.maximum(acc_ref[...], jnp.max(z4, axis=0, keepdims=True))

    @pl.when(t == pl.num_programs(1) - 1)
    def _():
        # relu(max_i z_i + t4) == max_i relu(z_i + t4)  (exact).
        pooled_ref[0] = jnp.maximum(acc_ref[...] + t4[...], 0.0)     # (1, C4)


# ---------------------------------------------------------------------------
# Kernel 2: FC head, batched over all B rows at once.
# ---------------------------------------------------------------------------
def _head_kernel(p_ref, fw1, ft1, fw2, ft2, fw3, ft3, fw4, fb4, out_ref):
    g = p_ref[...]                                                   # (B, C4) f32
    g = jnp.maximum(jnp.dot(g.astype(jnp.bfloat16), fw1[...],
                            preferred_element_type=jnp.float32) + ft1[...], 0.0)
    g = jnp.maximum(jnp.dot(g.astype(jnp.bfloat16), fw2[...],
                            preferred_element_type=jnp.float32) + ft2[...], 0.0)
    g = jnp.maximum(jnp.dot(g.astype(jnp.bfloat16), fw3[...],
                            preferred_element_type=jnp.float32) + ft3[...], 0.0)
    z = jnp.dot(g.astype(jnp.bfloat16), fw4[...],
                preferred_element_type=jnp.float32) + fb4[...]       # (B, 1)
    out_ref[...] = jax.nn.sigmoid(z)


# ---------------------------------------------------------------------------
# Wrapper
# ---------------------------------------------------------------------------
def _pick_tile(n, max_tile):
    """Largest divisor of n <= max_tile; prefer multiples of 16 (bf16 sublane
    packing), accept multiples of 8."""
    assert n % 8 == 0, "sequence length must be a multiple of 8"
    best = None
    t = min(max_tile, n)
    t -= t % 8
    while t >= 8:
        if n % t == 0:
            if t % 16 == 0:
                return t
            if best is None:
                best = t
        t -= 8
    return best if best is not None else n


def _const_spec(arr):
    nd = arr.ndim
    return pl.BlockSpec(arr.shape, lambda *_, _nd=nd: (0,) * _nd)


def coordinate_to_predict(x_ncl, conv_params, fc_params, *, max_tile=2048):
    """x_ncl: (B, 4, N) as in PyTorch NCL; returns (B,) sigmoid scores."""
    B, c_in, N = x_ncl.shape
    assert c_in == C_IN
    x = jnp.transpose(x_ncl, (0, 2, 1)).astype(jnp.bfloat16)         # (B, N, C_IN)
    tile = _pick_tile(N, max_tile)

    def prep(params):  # weights -> bf16 (MXU operands), shifts/bias stay f32
        return [p.astype(jnp.bfloat16) if i % 2 == 0 else p.astype(jnp.float32)
                for i, p in enumerate(params)]

    cps = prep(conv_params)
    fps = prep(fc_params)

    macs = C_IN * C1 + C1 * C2 + C2 * C3 + C3 * C4
    conv_cost = pl.CostEstimate(
        flops=2 * B * N * macs,
        transcendentals=0,
        bytes_accessed=B * N * C_IN * 2 + B * C4 * 4
                       + sum(int(p.size) * p.dtype.itemsize for p in cps))

    # --- kernel 1: conv stack + global max pool -> pooled (B, 1, C4) f32 ----
    pooled = pl.pallas_call(
        _conv_pool_kernel,
        out_shape=jax.ShapeDtypeStruct((B, 1, C4), jnp.float32),
        grid_spec=pltpu.PrefetchScalarGridSpec(
            num_scalar_prefetch=0,
            grid=(B, N // tile),
            in_specs=[pl.BlockSpec((1, tile, C_IN), lambda b, t: (b, t, 0))]
                     + [_const_spec(p) for p in cps],
            out_specs=pl.BlockSpec((1, 1, C4), lambda b, t: (b, 0, 0)),
            scratch_shapes=[pltpu.VMEM((1, C4), jnp.float32)],
        ),
        compiler_params=pltpu.CompilerParams(
            dimension_semantics=("parallel", "arbitrary"),
            vmem_limit_bytes=40 << 20),
        cost_estimate=conv_cost,
    )(x, *cps)

    pooled = pooled.reshape(B, C4)

    # --- kernel 2: FC head over all B rows in one shot -----------------------
    out = pl.pallas_call(
        _head_kernel,
        out_shape=jax.ShapeDtypeStruct((B, 1), jnp.float32),
        grid_spec=pltpu.PrefetchScalarGridSpec(
            num_scalar_prefetch=0,
            grid=(1,),
            in_specs=[pl.BlockSpec((B, C4), lambda i: (0, 0))]
                     + [_const_spec(p) for p in fps],
            out_specs=pl.BlockSpec((B, 1), lambda i: (0, 0)),
        ),
        compiler_params=pltpu.CompilerParams(
            dimension_semantics=("arbitrary",)),
    )(pooled, *fps)

    return out.reshape(B)


# ---------------------------------------------------------------------------
# Parameter construction (deterministic, synthetic).  BatchNorm uses
# inference-mode running statistics folded into the weight columns + shift:
#   BN(x @ w + b) == x @ (w * s) + (b * s + beta - mean * s),  s = gamma/sqrt(var+eps)
# ---------------------------------------------------------------------------
def _fold_linear_bn(key, c_in, c_out):
    kw, kb, kg, kbe, km, kv = jax.random.split(key, 6)
    w = 0.1 * jax.random.normal(kw, (c_in, c_out), jnp.float32)
    b = 0.1 * jax.random.normal(kb, (c_out,), jnp.float32)
    gamma = 1.0 + 0.1 * jax.random.normal(kg, (c_out,), jnp.float32)
    beta = 0.1 * jax.random.normal(kbe, (c_out,), jnp.float32)
    mean = 0.1 * jax.random.normal(km, (c_out,), jnp.float32)
    var = 1.0 + 0.1 * jax.random.uniform(kv, (c_out,), jnp.float32)
    s = gamma / jnp.sqrt(var + BN_EPS)
    w_folded = w * s[None, :]
    shift = (b * s + beta - mean * s)[None, :]
    return w_folded, shift


def init_params(key):
    ks = jax.random.split(key, 8)
    conv_params = []
    for k, (ci, co) in zip(ks[:4], [(C_IN, C1), (C1, C2), (C2, C3), (C3, C4)]):
        conv_params.extend(_fold_linear_bn(k, ci, co))
    fc_params = []
    for k, (ci, co) in zip(ks[4:7], [(C4, F1), (F1, F2), (F2, F3)]):
        fc_params.extend(_fold_linear_bn(k, ci, co))
    kw, kb = jax.random.split(ks[7], 2)
    w_out = 0.1 * jax.random.normal(kw, (F3, 1), jnp.float32)
    b_out = 0.1 * jax.random.normal(kb, (1, 1), jnp.float32)
    fc_params.extend([w_out, b_out])
    return conv_params, fc_params


# ---------------------------------------------------------------------------
# Pure-JAX reference (same bf16-operand / f32-accumulate numerics).
# ---------------------------------------------------------------------------
def reference_forward(x_ncl, conv_params, fc_params):
    h = jnp.transpose(x_ncl, (0, 2, 1)).astype(jnp.bfloat16)
    for i in range(4):
        w, t = conv_params[2 * i], conv_params[2 * i + 1]
        h = jnp.maximum(jnp.dot(h.astype(jnp.bfloat16), w.astype(jnp.bfloat16),
                                preferred_element_type=jnp.float32) + t, 0.0)
    g = jnp.max(h, axis=1)                                           # (B, C4)
    for i in range(3):
        w, t = fc_params[2 * i], fc_params[2 * i + 1]
        g = jnp.maximum(jnp.dot(g.astype(jnp.bfloat16), w.astype(jnp.bfloat16),
                                preferred_element_type=jnp.float32) + t, 0.0)
    z = jnp.dot(g.astype(jnp.bfloat16), fc_params[6].astype(jnp.bfloat16),
                preferred_element_type=jnp.float32) + fc_params[7]
    return jax.nn.sigmoid(z)[:, 0]


if __name__ == "__main__":
    key = jax.random.PRNGKey(0)
    kp, kx = jax.random.split(key)
    conv_params, fc_params = init_params(kp)

    B, N = 2, 256   # small stand-in for the production N = 4096
    x = jax.random.normal(kx, (B, C_IN, N), jnp.float32)  # PyTorch NCL input

    # max_tile=128 here so the small test exercises >1 reduction step per
    # batch row (accumulator init / finalize paths); the production default
    # (max_tile=2048) gives 2 steps per batch row at N=4096.
    out = coordinate_to_predict(x, conv_params, fc_params, max_tile=128)
    out = jax.block_until_ready(out)

    ref = reference_forward(x, conv_params, fc_params)
    assert out.shape == (B,)
    assert jnp.allclose(out, ref, atol=1e-3, rtol=1e-3), (out, ref)

    print("KERNEL_OK")
</pallas_src>

<mosaic_0001>
module attributes {stable_mosaic.version = 11 : i64} {
  func.func @_conv_pool_kernel(%arg0: i32, %arg1: i32, %arg2: memref<1x128x4xbf16, #tpu.memory_space<vmem>>, %arg3: memref<4x64xbf16, #tpu.memory_space<vmem>>, %arg4: memref<1x64xf32, #tpu.memory_space<vmem>>, %arg5: memref<64x64xbf16, #tpu.memory_space<vmem>>, %arg6: memref<1x64xf32, #tpu.memory_space<vmem>>, %arg7: memref<64x128xbf16, #tpu.memory_space<vmem>>, %arg8: memref<1x128xf32, #tpu.memory_space<vmem>>, %arg9: memref<128x1024xbf16, #tpu.memory_space<vmem>>, %arg10: memref<1x1024xf32, #tpu.memory_space<vmem>>, %arg11: memref<1x1x1024xf32, #tpu.memory_space<vmem>>, %arg12: memref<1x1024xf32, #tpu.memory_space<vmem>>) attributes {dimension_semantics = [#tpu.dimension_semantics<parallel>, #tpu.dimension_semantics<arbitrary>], iteration_bounds = array<i64: 2, 2>, scalar_prefetch = 0 : i64, scratch_operands = 1 : i64, tpu.core_type = #tpu.core_type<tc>, window_params = [{transform_indices = @transform_0, window_bounds = array<i64: 1, 128, 4>}, {pipeline_mode = #tpu.pipeline_mode<synchronous>, transform_indices = @transform_1, window_bounds = array<i64: 4, 64>}, {pipeline_mode = #tpu.pipeline_mode<synchronous>, transform_indices = @transform_2, window_bounds = array<i64: 1, 64>}, {pipeline_mode = #tpu.pipeline_mode<synchronous>, transform_indices = @transform_3, window_bounds = array<i64: 64, 64>}, {pipeline_mode = #tpu.pipeline_mode<synchronous>, transform_indices = @transform_4, window_bounds = array<i64: 1, 64>}, {pipeline_mode = #tpu.pipeline_mode<synchronous>, transform_indices = @transform_5, window_bounds = array<i64: 64, 128>}, {pipeline_mode = #tpu.pipeline_mode<synchronous>, transform_indices = @transform_6, window_bounds = array<i64: 1, 128>}, {pipeline_mode = #tpu.pipeline_mode<synchronous>, transform_indices = @transform_7, window_bounds = array<i64: 128, 1024>}, {pipeline_mode = #tpu.pipeline_mode<synchronous>, transform_indices = @transform_8, window_bounds = array<i64: 1, 1024>}, {transform_indices = @transform_9, window_bounds = array<i64: 1, 1, 1024>}]} {
    %c0_i32 = arith.constant 0 : i32
    %0 = arith.cmpi eq, %arg1, %c0_i32 : i32
    %1 = arith.extui %0 : i1 to i32
    %c0_i32_0 = arith.constant 0 : i32
    %2 = arith.cmpi ne, %1, %c0_i32_0 : i32
    scf.if %2 {
      %cst_29 = arith.constant 0xFF800000 : f32
      %39 = vector.broadcast %cst_29 : f32 to vector<1x1024xf32>
      %c0_30 = arith.constant 0 : index
      %c0_31 = arith.constant 0 : index
      %40 = vector.load %arg12[%c0_30, %c0_31] : memref<1x1024xf32, #tpu.memory_space<vmem>>, vector<1x1024xf32>
      tpu.vector_store %arg12[%c0_30, %c0_31], %39 {strides = array<i32>} : memref<1x1024xf32, #tpu.memory_space<vmem>>, vector<1x1024xf32>,
    } else {
    }
    %c0 = arith.constant 0 : index
    %c0_1 = arith.constant 0 : index
    %c0_2 = arith.constant 0 : index
    %3 = vector.load %arg2[%c0, %c0_1, %c0_2] : memref<1x128x4xbf16, #tpu.memory_space<vmem>>, vector<1x128x4xbf16>
    %4 = vector.shape_cast %3 : vector<1x128x4xbf16> to vector<128x4xbf16>
    %c0_3 = arith.constant 0 : index
    %c0_4 = arith.constant 0 : index
    %5 = vector.load %arg3[%c0_3, %c0_4] : memref<4x64xbf16, #tpu.memory_space<vmem>>, vector<4x64xbf16>
    %cst = arith.constant dense<0.000000e+00> : vector<128x64xf32>
    %6 = tpu.matmul %4, %5, %cst {dimension_numbers = #tpu.dot_dimension_numbers<[1], [0], [0], [1], [0, 0, 1, 1], [], []>} : vector<128x4xbf16>, vector<4x64xbf16>, vector<128x64xf32> -> vector<128x64xf32>
    %c0_5 = arith.constant 0 : index
    %c0_6 = arith.constant 0 : index
    %7 = vector.load %arg4[%c0_5, %c0_6] : memref<1x64xf32, #tpu.memory_space<vmem>>, vector<1x64xf32>
    %8 = vector.broadcast %7 : vector<1x64xf32> to vector<128x64xf32>
    %9 = arith.addf %6, %8 : vector<128x64xf32>
    %cst_7 = arith.constant 0.000000e+00 : f32
    %10 = vector.broadcast %cst_7 : f32 to vector<128x64xf32>
    %11 = arith.maximumf %9, %10 : vector<128x64xf32>
    %12 = arith.truncf %11 : vector<128x64xf32> to vector<128x64xbf16>
    %c0_8 = arith.constant 0 : index
    %c0_9 = arith.constant 0 : index
    %13 = vector.load %arg5[%c0_8, %c0_9] : memref<64x64xbf16, #tpu.memory_space<vmem>>, vector<64x64xbf16>
    %cst_10 = arith.constant dense<0.000000e+00> : vector<128x64xf32>
    %14 = tpu.matmul %12, %13, %cst_10 {dimension_numbers = #tpu.dot_dimension_numbers<[1], [0], [0], [1], [0, 0, 1, 1], [], []>} : vector<128x64xbf16>, vector<64x64xbf16>, vector<128x64xf32> -> vector<128x64xf32>
    %c0_11 = arith.constant 0 : index
    %c0_12 = arith.constant 0 : index
    %15 = vector.load %arg6[%c0_11, %c0_12] : memref<1x64xf32, #tpu.memory_space<vmem>>, vector<1x64xf32>
    %16 = vector.broadcast %15 : vector<1x64xf32> to vector<128x64xf32>
    %17 = arith.addf %14, %16 : vector<128x64xf32>
    %cst_13 = arith.constant 0.000000e+00 : f32
    %18 = vector.broadcast %cst_13 : f32 to vector<128x64xf32>
    %19 = arith.maximumf %17, %18 : vector<128x64xf32>
    %20 = arith.truncf %19 : vector<128x64xf32> to vector<128x64xbf16>
    %c0_14 = arith.constant 0 : index
    %c0_15 = arith.constant 0 : index
    %21 = vector.load %arg7[%c0_14, %c0_15] : memref<64x128xbf16, #tpu.memory_space<vmem>>, vector<64x128xbf16>
    %cst_16 = arith.constant dense<0.000000e+00> : vector<128x128xf32>
    %22 = tpu.matmul %20, %21, %cst_16 {dimension_numbers = #tpu.dot_dimension_numbers<[1], [0], [0], [1], [0, 0, 1, 1], [], []>} : vector<128x64xbf16>, vector<64x128xbf16>, vector<128x128xf32> -> vector<128x128xf32>
    %c0_17 = arith.constant 0 : index
    %c0_18 = arith.constant 0 : index
    %23 = vector.load %arg8[%c0_17, %c0_18] : memref<1x128xf32, #tpu.memory_space<vmem>>, vector<1x128xf32>
    %24 = vector.broadcast %23 : vector<1x128xf32> to vector<128x128xf32>
    %25 = arith.addf %22, %24 : vector<128x128xf32>
    %cst_19 = arith.constant 0.000000e+00 : f32
    %26 = vector.broadcast %cst_19 : f32 to vector<128x128xf32>
    %27 = arith.maximumf %25, %26 : vector<128x128xf32>
    %28 = arith.truncf %27 : vector<128x128xf32> to vector<128x128xbf16>
    %c0_20 = arith.constant 0 : index
    %c0_21 = arith.constant 0 : index
    %29 = vector.load %arg9[%c0_20, %c0_21] : memref<128x1024xbf16, #tpu.memory_space<vmem>>, vector<128x1024xbf16>
    %cst_22 = arith.constant dense<0.000000e+00> : vector<128x1024xf32>
    %30 = tpu.matmul %28, %29, %cst_22 {dimension_numbers = #tpu.dot_dimension_numbers<[1], [0], [0], [1], [0, 0, 1, 1], [], []>} : vector<128x128xbf16>, vector<128x1024xbf16>, vector<128x1024xf32> -> vector<128x1024xf32>
    %c0_23 = arith.constant 0 : index
    %c0_24 = arith.constant 0 : index
    %31 = vector.load %arg12[%c0_23, %c0_24] : memref<1x1024xf32, #tpu.memory_space<vmem>>, vector<1x1024xf32>
    %cst_25 = arith.constant dense<0xFF800000> : vector<1024xf32>
    %32 = vector.multi_reduction <maximumf>, %30, %cst_25 [0] : vector<128x1024xf32> to vector<1024xf32>
    %33 = vector.shape_cast %32 : vector<1024xf32> to vector<1x1024xf32>
    %34 = arith.maximumf %31, %33 : vector<1x1024xf32>
    %c0_26 = arith.constant 0 : index
    %c0_27 = arith.constant 0 : index
    %35 = vector.load %arg12[%c0_26, %c0_27] : memref<1x1024xf32, #tpu.memory_space<vmem>>, vector<1x1024xf32>
    tpu.vector_store %arg12[%c0_26, %c0_27], %34 {strides = array<i32>} : memref<1x1024xf32, #tpu.memory_space<vmem>>, vector<1x1024xf32>,
    %c1_i32 = arith.constant 1 : i32
    %36 = arith.cmpi eq, %arg1, %c1_i32 : i32
    %37 = arith.extui %36 : i1 to i32
    %c0_i32_28 = arith.constant 0 : i32
    %38 = arith.cmpi ne, %37, %c0_i32_28 : i32
    scf.if %38 {
      %c0_29 = arith.constant 0 : index
      %c0_30 = arith.constant 0 : index
      %39 = vector.load %arg12[%c0_29, %c0_30] : memref<1x1024xf32, #tpu.memory_space<vmem>>, vector<1x1024xf32>
      %c0_31 = arith.constant 0 : index
      %c0_32 = arith.constant 0 : index
      %40 = vector.load %arg10[%c0_31, %c0_32] : memref<1x1024xf32, #tpu.memory_space<vmem>>, vector<1x1024xf32>
      %41 = arith.addf %39, %40 : vector<1x1024xf32>
      %cst_33 = arith.constant 0.000000e+00 : f32
      %42 = vector.broadcast %cst_33 : f32 to vector<1x1024xf32>
      %43 = arith.maximumf %41, %42 : vector<1x1024xf32>
      %c0_34 = arith.constant 0 : index
      %c0_35 = arith.constant 0 : index
      %c0_36 = arith.constant 0 : index
      %44 = vector.load %arg11[%c0_34, %c0_35, %c0_36] : memref<1x1x1024xf32, #tpu.memory_space<vmem>>, vector<1x1x1024xf32>
      %45 = vector.shape_cast %44 : vector<1x1x1024xf32> to vector<1x1024xf32>
      %46 = vector.shape_cast %43 : vector<1x1024xf32> to vector<1x1x1024xf32>
      tpu.vector_store %arg11[%c0_34, %c0_35, %c0_36], %46 {strides = array<i32>} : memref<1x1x1024xf32, #tpu.memory_space<vmem>>, vector<1x1x1024xf32>,
    } else {
    }
    return
  }
  func.func @transform_0(%arg0: i32, %arg1: i32) -> (i32, i32, i32) {
    %c0_i32 = arith.constant 0 : i32
    %c0_i32_0 = arith.constant 0 : i32
    return %arg0, %arg1, %c0_i32 : i32, i32, i32
  }
  func.func @transform_1(%arg0: i32, %arg1: i32) -> (i32, i32) {
    %c0_i32 = arith.constant 0 : i32
    %c0_i32_0 = arith.constant 0 : i32
    %c0_i32_1 = arith.constant 0 : i32
    return %c0_i32, %c0_i32_0 : i32, i32
  }
  func.func @transform_2(%arg0: i32, %arg1: i32) -> (i32, i32) {
    %c0_i32 = arith.constant 0 : i32
    %c0_i32_0 = arith.constant 0 : i32
    %c0_i32_1 = arith.constant 0 : i32
    return %c0_i32, %c0_i32_0 : i32, i32
  }
  func.func @transform_3(%arg0: i32, %arg1: i32) -> (i32, i32) {
    %c0_i32 = arith.constant 0 : i32
    %c0_i32_0 = arith.constant 0 : i32
    %c0_i32_1 = arith.constant 0 : i32
    return %c0_i32, %c0_i32_0 : i32, i32
  }
  func.func @transform_4(%arg0: i32, %arg1: i32) -> (i32, i32) {
    %c0_i32 = arith.constant 0 : i32
    %c0_i32_0 = arith.constant 0 : i32
    %c0_i32_1 = arith.constant 0 : i32
    return %c0_i32, %c0_i32_0 : i32, i32
  }
  func.func @transform_5(%arg0: i32, %arg1: i32) -> (i32, i32) {
    %c0_i32 = arith.constant 0 : i32
    %c0_i32_0 = arith.constant 0 : i32
    %c0_i32_1 = arith.constant 0 : i32
    return %c0_i32, %c0_i32_0 : i32, i32
  }
  func.func @transform_6(%arg0: i32, %arg1: i32) -> (i32, i32) {
    %c0_i32 = arith.constant 0 : i32
    %c0_i32_0 = arith.constant 0 : i32
    %c0_i32_1 = arith.constant 0 : i32
    return %c0_i32, %c0_i32_0 : i32, i32
  }
  func.func @transform_7(%arg0: i32, %arg1: i32) -> (i32, i32) {
    %c0_i32 = arith.constant 0 : i32
    %c0_i32_0 = arith.constant 0 : i32
    %c0_i32_1 = arith.constant 0 : i32
    return %c0_i32, %c0_i32_0 : i32, i32
  }
  func.func @transform_8(%arg0: i32, %arg1: i32) -> (i32, i32) {
    %c0_i32 = arith.constant 0 : i32
    %c0_i32_0 = arith.constant 0 : i32
    %c0_i32_1 = arith.constant 0 : i32
    return %c0_i32, %c0_i32_0 : i32, i32
  }
  func.func @transform_9(%arg0: i32, %arg1: i32) -> (i32, i32, i32) {
    %c0_i32 = arith.constant 0 : i32
    %c0_i32_0 = arith.constant 0 : i32
    %c0_i32_1 = arith.constant 0 : i32
    return %arg0, %c0_i32, %c0_i32_0 : i32, i32, i32
  }
}

</mosaic_0001>

<bundles_post_ra>
// kernel: tpu_custom_call.1
= control target key start
LH: loop header
LB: loop body
LE: loop exit
PB: predicated region body
PF: predicated region fallthrough
CT: control target
= control target key end

     0   :  { %s3009_s0 = inlined_call_operand.vmem [shape: bf16[2,256,4], index: 0, kind: input, shape index: {}]   ;;  %s3010_s1 = inlined_call_operand.vmem [shape: bf16[4,64], index: 1, kind: input, shape index: {}]   ;;  %s3011_s2 = inlined_call_operand.vmem [shape: f32[1,64], index: 2, kind: input, shape index: {}]   ;;  %s3012_s3 = inlined_call_operand.vmem [shape: bf16[64,64], index: 3, kind: input, shape index: {}]   ;;  %s3013_s4 = inlined_call_operand.vmem [shape: f32[1,64], index: 4, kind: input, shape index: {}]   ;;  %s3014_s5 = inlined_call_operand.vmem [shape: bf16[64,128], index: 5, kind: input, shape index: {}]   ;;  %s3015_s6 = inlined_call_operand.vmem [shape: f32[1,128], index: 6, kind: input, shape index: {}]   ;;  %s3016_s7 = inlined_call_operand.hbm [shape: bf16[128,1024], index: 7, kind: input, shape index: {}]   ;;  %s3017_s8 = inlined_call_operand.vmem [shape: f32[1,1024], index: 8, kind: input, shape index: {}]   ;;  %s3018_s9 = inlined_call_operand.hbm [shape: f32[2,1,1024], index: 9, kind: output, shape index: {}]  }
   0x1   :  { %3022 = sst [smem:[#allocation12_spill]] %s3016_s7 }
   0x2   :  { %14 = vsyncpa [#allocation4], 0 }
   0x3   :  { %15 = vsyncpa [#allocation5], 0 }
   0x4   :  { %17 = vsyncpa [#allocation5 + $0x1], 0  ;;  %s2653_s30 = smov 0   ;;  %s2655_s10 = smov 0  }
   0x5   :  { %s2657_s11 = smov 0   ;;  %s2659_s12 = smov 0  }
   0x6   :  { %s2661_s13 = smov 0   ;;  %s2663_s14 = smov 0  }
   0x7   :  { %s2665_s15 = smov 0   ;;  %s2667_s16 = smov 0  }
   0x8 LB: > { %3023 = sst [smem:[#allocation9_spill]] %s2590_s15  ;;  %s2140_s17 = sadd.s32 4294967295, %s2594_s16   ;;  %s2594_s16 = sphi %s2667_s16, %s23_s16   ;;  %s2590_s15 = sphi %s2665_s15, %s3035_s15   ;;  %s2586_s14 = sphi %s2663_s14, %s3040_s14   ;;  %s2582_s13 = sphi %s2661_s13, %s3033_s13   ;;  %s2578_s12 = sphi %s2659_s12, %s3039_s12   ;;  %s2574_s11 = sphi %s2657_s11, %s3038_s11   ;;  %s2570_s10 = sphi %s2655_s10, %s3037_s10   ;;  %s2566_s30 = sphi %s2653_s30, %s3036_s30  }
   0x9   : > { %s2141_s18 = sadd.s32 4294967294, %s2594_s16   ;;  %s32_s19 = sadd.s32 1, %s2586_s14 }
   0xa   : > { %s35_s20 = sadd.s32 1, %s2590_s15  ;;  %p33_p0 = scmp.ge.s32.totalorder %s32_s19, 2 }
   0xb   : > { %s238_s21 = sadd.s32 1, %s2574_s11  ;;  %p248_p1 = scmp.ne.s32.totalorder %s2574_s11, %s2570_s10 }
   0xc   : > { %p249_p2 = scmp.eq.s32.totalorder %s2140_s17, 3  ;;  %s3042_s19 = smov (%p33_p0, %s32_s19), 0 }
   0xd   : > { %3024 = sst [smem:[#allocation10_spill]] %s3042_s19  ;;  %s3044_s20 = smov (!%p33_p0, %s35_s20), %s2590_s15 }
   0xe   : > { %p2703_p3 = por %p249_p2, %p248_p1  ;;  %p254_p4 = scmp.ne.s32.totalorder %s2570_s10, %s2566_s30 }
   0xf   : > { %p37_p5 = scmp.ge.s32.totalorder %s3044_s20, 2  ;;  %p255_p6 = scmp.eq.s32.totalorder %s2141_s18, 3 }
  0x10   : > { %p2142_p7 = scmp.ge.s32.totalorder %s2594_s16, 1  ;;  %p262_p8 = scmp.lt.s32.totalorder %s2594_s16, 5 }
  0x11   : > { %s3046_s20 = smov (%p37_p5, %s3044_s20), 0  ;;  %p2713_p9 = por %p255_p6, %p254_p4 }
  0x12   : > { %3026 = sst [smem:[#allocation11_spill]] %s3046_s20  ;;  %p2717_p10 = pnand %p2142_p7, %p262_p8 }
  0x13   : > { %s235_s25 = ssub.s32 %s2590_s15, %s3046_s20  ;;  %p2725_p13 = scmp.eq.s32.totalorder %s2140_s17, 0 }
  0x14   : > { %p236_p11 = scmp.eq.s32.totalorder %s235_s25, 0  ;;  %p2375_p12 = pneg %p2717_p10 }
  0x15   : > { %s2596_s28 = smov [#allocation3]  }
  0x16   : > { %s2730_s27 = scalar_select %p236_p11, %s2574_s11, %s238_s21  }
  0x17   : > { %s292_s29 = sshll.u32 %s2596_s28, 4  ;;  %p2734_p0 = pnand %p2725_p13, %p2375_p12  ;;  %s293_s29 = int_to_ptr.vmem [resolvable:$true] %s292_s29 }
  0x18   : > { %s2483_s25 = scalar_lea.vmem %s293_s29, 8192  ;;  %p2491_p6 = scmp.lt.s32.totalorder %s293_s29, %s293_s29 }
  0x19   : > { %p2474_p1 = pneg %p2734_p0  ;;  %p2484_p2 = scmp.ne.s32.totalorder %s293_s29, %s2483_s25 }
  0x1a   : > { %p2492_p7 = scmp.lt.s32.totalorder %s2483_s25, %s2483_s25 }
  0x1b   : > { %p2486_p4 = pnand %p2484_p2, %p2474_p1 }
  0x1c   : > { %p2493_p8 = por %p2492_p7, %p2491_p6 }
  0x1d   : > { %p2487_p5 = pneg %p2486_p4 }
  0x1f   : > { %p2494_p11 = pnand %p2493_p8, %p2487_p5 }
  0x21   : > { %2497 = shalt.err (!%p2494_p11)
}
  0x22   : > { %s2597_s17 = smov 512   ;;  %s2598_s21 = smov 32  }
  0x23   : > { %s3031_s7 = sld [smem:[#allocation12_spill]] }
  0x25   : > { %324 = sbr.rel (%p2717_p10) target bundleno = 1060 (0x424), region = 56 }
  0x29   : > { %2378 = dma.hbm_to_vmem [thread:$0]  (!%p2734_p0), %s3031_s7, 8192, %s293_s29, [#allocation4], %s2597_s17, %s2597_s17, %s2598_s21  }
  0x2a   : > { %2557 = dma.done.wait (%p2725_p13), [#allocation4], 8192  }
  0x2b   : > { %2559 = vsyncadd (%p2725_p13), [#allocation4], 4294959104  ;;  %s3020_s25 = sand.u32 1, %s2570_s10   ;;  %s2148_s18 = sshll.u32 %s2578_s12, 4 }
  0x2c   : > { %s2755_s19 = sshll.u32 %s3020_s25, 3  ;;  %p365_p12 = scmp.lt.s32.totalorder %s2582_s13, 1 }
  0x2d   : > { %p367_p0 = scmp.lt.s32.totalorder %s2148_s18, 31  ;;  %s363_s7 = scalar_lea.vmem [#allocation6], %s2755_s19 }
  0x2e   : > { %s366_s20 = scalar_select %p365_p12, %s2582_s13, 1 }
  0x2f   : > { %s3048_s18 = smov (!%p367_p0, %s2148_s18), 31  ;;  %p2151_p10 = scmp.ne.s32.totalorder %s2578_s12, 0 }
  0x30   : > { %s2149_s24 = sshll.u32 %s366_s20, 5 }
  0x31   : > { %s370_s29 = sadd.s32 %s2149_s24, %s3048_s18  ;;  %378 = sbr.rel (%p2151_p10) target bundleno = 56 (0x38), region = 64 }
  0x32   : > { %s2150_s17 = sshll.u32 %s370_s29, 2 }
  0x33   : > { %s372_s28 = scalar_lea.vmem %s3009_s0, %s2150_s17 }
  0x36   : > { %v2599_v0 = vmov -inf  }
  0x37   : > { %379 = vst [vmem:[#allocation2] sm:$0xff] %v2599_v0 }
  0x38 PF: > { %v396_v1 = vld [vmem:[%s3010_s1] sm:$0x3]  ;;  %vm469_vm0 = vcmask 1041408   ;;  %vm444_vm1 = vcmask 31744   ;;  %v2457_v4 = vld [vmem:[%s372_s28 + $0x8] sm:$0xff]   ;;  %v2458_v5 = vld [vmem:[%s372_s28 + $0x10] sm:$0xff]  }
  0x39   : > { %v2456_v2 = vld [vmem:[%s372_s28] sm:$0xff]   ;;  %2367 = vmatprep.subr.msk.bf16.mxu0 %vm469_vm0, %v396_v1  ;;  %v471_v3 = vsel %vm469_vm0, %v396_v1, 0  ;;  %2368 = vmatprep.subr.msk.bf16.mxu1 %vm469_vm0, %v396_v1  ;;  %v2461_v7 = vld [vmem:[%s372_s28 + $0x28] sm:$0xff]   ;;  %v2462_v8 = vld [vmem:[%s372_s28 + $0x30] sm:$0xff]   ;;  %vm633_vm2 = vcmask 523264   ;;  %p2259_p13 = scmp.ne.s32.totalorder %s2578_s12, 1 }
  0x3a   : > { %2300 = vmatpush3.bf16.msra.mxu0 %v471_v3  ;;  %2301 = vmatprep.mubr.msk.bf16.mxu0 %vm444_vm1, %v2456_v2  ;;  %v2460_v6 = vld [vmem:[%s372_s28 + $0x20] sm:$0xff]   ;;  %v2459_v9 = vld [vmem:[%s372_s28 + $0x18] sm:$0xff]   ;;  %v2465_v12 = vld [vmem:[%s3012_s3 + $0x10] sm:$0xff]  }
  0x3b   : > { %2366 = vmatpush3.bf16.msra.mxu1 %v471_v3  ;;  %2309 = vmatprep.mubr.msk.bf16.mxu1 %vm444_vm1, %v2460_v6  ;;  %v2464_v10 = vld [vmem:[%s3012_s3 + $0x18] sm:$0xff]   ;;  %v2466_v13 = vld [vmem:[%s3012_s3 + $0x8] sm:$0xff]   ;;  %v2467_v14 = vld [vmem:[%s3012_s3] sm:$0xff]  }
  0x3c   : > { %v2463_v11 = vld [vmem:[%s372_s28 + $0x38] sm:$0xff]   ;;  %2317 = vmatprep.subr.bf16.mxu1 %v2464_v10  ;;  %v2152_v18 = vld [vmem:[%s3011_s2] ss:$0 sm:$0xff] }
  0x3d   : > { %2302 = vmatmul.mubr.msk.bf16.vlgmr.msra.gmra.mxu0 %vm444_vm1, %v2457_v4  ;;  %v2468_v15 = vld [vmem:[%s3014_s5 + $0x18] sm:$0xff]  }
  0x3e   : > { %2305 = vmatprep.mubr.msk.bf16.mxu0 %vm444_vm1, %v2458_v5  ;;  %2310 = vmatmul.mubr.msk.bf16.vlgmr.msra.gmra.mxu1 %vm444_vm1, %v2461_v7 }
  0x3f   : > { %2313 = vmatprep.mubr.msk.bf16.mxu1 %vm444_vm1, %v2462_v8  ;;  %2318 = vmatpush3.bf16.msra.mxu1 %v2464_v10  ;;  %v2470_v10 = vld [vmem:[%s3014_s5 + $0x8] sm:$0xff]  }
  0x40   : > { %2319 = vmatprep.subr.bf16.mxu1 %v2465_v12  ;;  %2341 = vmatprep.subr.bf16.mxu0 %v2468_v15 }
  0x41   : > { %2342 = vmatpush3.bf16.msra.mxu0 %v2468_v15 }
  0x43   : > { %2320 = vmatpush3.bf16.msra.mxu1 %v2465_v12  ;;  %v1019_v12 = vld [vmem:[#allocation3 + $0x1c0] sm:$0xff] }
  0x44   : > { %2321 = vmatprep.subr.bf16.mxu1 %v2466_v13 }
  0x45   : > { %2306 = vmatmul.mubr.msk.bf16.gmra.mxu0 %vm444_vm1, %v2459_v9  ;;  %v2469_v9 = vld [vmem:[%s3014_s5 + $0x10] sm:$0xff]  }
  0x46   : > { %2314 = vmatmul.mubr.msk.bf16.gmra.mxu1 %vm444_vm1, %v2463_v11  ;;  %2343 = vmatprep.subr.bf16.mxu0 %v2469_v9  ;;  %v2471_v11 = vld [vmem:[%s3014_s5] sm:$0xff]  }
  0x47   : > { %2322 = vmatpush3.bf16.msra.mxu1 %v2466_v13  ;;  %2344 = vmatpush3.bf16.msra.mxu0 %v2469_v9  ;;  %v1023_v13 = vld [vmem:[#allocation3 + $0x1e0] sm:$0xff] }
  0x48   : > { %2323 = vmatprep.subr.bf16.mxu1 %v2467_v14  ;;  %2345 = vmatprep.subr.bf16.mxu0 %v2470_v10  ;;  %v2251_v15 = vcombine.low %v1019_v12, %v1023_v13 }
  0x4b   : > { %2324 = vmatpush3.bf16.msra.mxu1 %v2467_v14  ;;  %2346 = vmatpush3.bf16.msra.mxu0 %v2470_v10  ;;  %v2810_v14 = vld [vmem:[#allocation3 + $0x1c8] sm:$0xff] }
  0x4c   : > { %2347 = vmatprep.subr.bf16.mxu0 %v2471_v11 }
  0x4f   : > { %2348 = vmatpush3.bf16.msra.mxu0 %v2471_v11 }
  0xfd   : > { %v2303_v16 = vpop.f32.mrf.mxu0 }
  0xfe   : > { %v2311_v19 = vpop.f32.mrf.mxu1  ;;  %v516_v24 = vadd.f32 %v2303_v16, %v2152_v18  ;;  %v2252_v16 = vcombine.high %v1019_v12, %v1023_v13 }
  0xff   : > { %v507_v17 = vpop.f32.mrf.mxu0  ;;  %v548_v56 = vadd.f32 %v2311_v19, %v2152_v18  ;;  %v1015_v19 = vld [vmem:[#allocation3 + $0x1a0] sm:$0xff] }
 0x100   : > { %v508_v21 = vadd.f32 %v2152_v18, %v507_v17  ;;  %v539_v23 = vpop.f32.mrf.mxu1  ;;  %v572_v33 = vmax.f32 %v516_v24, 0.0  ;;  %v1024_v17 = vld [vmem:[#allocation3 + $0x1e8] sm:$0xff]  ;;  %1347 = vmatprep.subr.bf16.mxu1 %v2252_v16  ;;  %v1007_v24 = vld [vmem:[#allocation3 + $0x160] sm:$0xff] }
 0x101   : > { %v2304_v20 = vpop.f32.mrf.mxu0  ;;  %v540_v36 = vadd.f32 %v2152_v18, %v539_v23  ;;  %v580_v62 = vmax.f32 %v548_v56, 0.0  ;;  %v1003_v23 = vld [vmem:[#allocation3 + $0x140] sm:$0xff] }
 0x102   : > { %v519_v22 = vadd.f32 %v2304_v20, %v2152_v18  ;;  %v2312_v27 = vpop.f32.mrf.mxu1  ;;  %v570_v30 = vmax.f32 %v508_v21, 0.0  ;;  %v2253_v20 = vcombine.low %v2810_v14, %v1024_v17  ;;  %v2254_v21 = vcombine.high %v2810_v14, %v1024_v17 }
 0x103   : > { %v510_v25 = vpop.f32.mrf.mxu0  ;;  %v578_v47 = vmax.f32 %v540_v36, 0.0  ;;  %v551_v57 = vadd.f32 %v2312_v27, %v2152_v18  ;;  %v995_v27 = vld [vmem:[#allocation3 + $0x100] sm:$0xff] }
 0x104   : > { %v511_v26 = vadd.f32 %v2152_v18, %v510_v25  ;;  %v573_v28 = vmax.f32 %v519_v22, 0.0  ;;  %v542_v32 = vpop.f32.mrf.mxu1  ;;  %1460 = vmatprep.subr.bf16.mxu0 %v2254_v21 }
 0x105   : > { %v2307_v29 = vpop.f32.mrf.mxu0  ;;  %v543_v39 = vadd.f32 %v2152_v18, %v542_v32  ;;  %v581_v63 = vmax.f32 %v551_v57, 0.0  ;;  %v991_v32 = vld [vmem:[#allocation3 + $0xe0] sm:$0xff] }
 0x106   : > { %v571_v31 = vmax.f32 %v511_v26, 0.0  ;;  %v532_v34 = vadd.f32 %v2307_v29, %v2152_v18  ;;  %v2315_v40 = vpop.f32.mrf.mxu1  ;;  %v587_v41 = vpack.c.bf16 %v573_v28, %v572_v33  ;;  %v2236_v26 = vcombine.high %v1003_v23, %v1007_v24  ;;  %v999_v28 = vld [vmem:[#allocation3 + $0x120] sm:$0xff] }
 0x107   : > { %v523_v35 = vpop.f32.mrf.mxu0  ;;  %v579_v51 = vmax.f32 %v543_v39, 0.0  ;;  %v591_v2 = vpack.c.bf16 %v581_v63, %v580_v62  ;;  %v564_v3 = vadd.f32 %v2315_v40, %v2152_v18  ;;  %v2235_v29 = vcombine.low %v1003_v23, %v1007_v24 }
 0x108   : > { %v586_v37 = vpack.c.bf16 %v571_v31, %v570_v30  ;;  %v524_v38 = vadd.f32 %v2152_v18, %v523_v35  ;;  %v555_v44 = vpop.f32.mrf.mxu1  ;;  %v576_v45 = vmax.f32 %v532_v34, 0.0  ;;  %v2228_v30 = vcombine.high %v995_v27, %v999_v28  ;;  %v987_v31 = vld [vmem:[#allocation3 + $0xc0] sm:$0xff] }
 0x109   : > { %v2308_v42 = vpop.f32.mrf.mxu0  ;;  %v590_v59 = vpack.c.bf16 %v579_v51, %v578_v47  ;;  %v556_v60 = vadd.f32 %v2152_v18, %v555_v44  ;;  %v584_v6 = vmax.f32 %v564_v3, 0.0  ;;  %v2227_v33 = vcombine.low %v995_v27, %v999_v28 }
 0x10a   : > { %v535_v43 = vadd.f32 %v2308_v42, %v2152_v18  ;;  %2325 = vmatprep.mubr.msk.bf16.mxu1 %vm633_vm2, %v586_v37  ;;  %v574_v48 = vmax.f32 %v524_v38, 0.0  ;;  %v2316_v52 = vpop.f32.mrf.mxu1  ;;  %v2220_v34 = vcombine.high %v987_v31, %v991_v32  ;;  %v2219_v35 = vcombine.low %v987_v31, %v991_v32  ;;  %v2817_v38 = vld [vmem:[%s3013_s4] ss:$0 sm:$0xff] }
 0x10b   : > { %v526_v46 = vpop.f32.mrf.mxu0  ;;  %2326 = vmatmul.mubr.msk.bf16.vlgmr.msra.gmra.mxu1 %vm633_vm2, %v587_v41  ;;  %v582_v0 = vmax.f32 %v556_v60, 0.0  ;;  %v567_v4 = vadd.f32 %v2316_v52, %v2152_v18  ;;  %v1008_v60 = vld [vmem:[#allocation3 + $0x168] sm:$0xff] }
 0x10c   : > { %v577_v49 = vmax.f32 %v535_v43, 0.0  ;;  %v527_v50 = vadd.f32 %v2152_v18, %v526_v46  ;;  %v558_v54 = vpop.f32.mrf.mxu1  ;;  %1348 = vmatpush1.bf16.msra.mxu1 %v2251_v15 }
 0x10d   : > { %v559_v61 = vadd.f32 %v2152_v18, %v558_v54  ;;  %v585_v7 = vmax.f32 %v567_v4, 0.0  ;;  %v1011_v18 = vld [vmem:[#allocation3 + $0x180] sm:$0xff] }
 0x10e   : > { %v575_v53 = vmax.f32 %v527_v50, 0.0  ;;  %v589_v55 = vpack.c.bf16 %v577_v49, %v576_v45  ;;  %v2244_v22 = vcombine.high %v1011_v18, %v1015_v19  ;;  %v2243_v25 = vcombine.low %v1011_v18, %v1015_v19  ;;  %v1012_v49 = vld [vmem:[#allocation3 + $0x188] sm:$0xff] }
 0x10f   : > { %v583_v1 = vmax.f32 %v559_v61, 0.0  ;;  %v593_v8 = vpack.c.bf16 %v585_v7, %v584_v6  ;;  %v1016_v50 = vld [vmem:[#allocation3 + $0x1a8] sm:$0xff] }
 0x110   : > { %v588_v58 = vpack.c.bf16 %v575_v53, %v574_v48  ;;  %1349 = vmatprep.subr.bf16.mxu1 %v2244_v22  ;;  %v2246_v56 = vcombine.high %v1012_v49, %v1016_v50  ;;  %v996_v6 = vld [vmem:[#allocation3 + $0x108] sm:$0xff] }
 0x111   : > { %v592_v5 = vpack.c.bf16 %v583_v1, %v582_v0  ;;  %1350 = vmatpush1.bf16.msra.mxu1 %v2243_v25  ;;  %v2245_v0 = vcombine.low %v1012_v49, %v1016_v50  ;;  %v1000_v7 = vld [vmem:[#allocation3 + $0x128] sm:$0xff] }
 0x112   : > { %2329 = vmatprep.mubr.msk.bf16.mxu1 %vm633_vm2, %v588_v58  ;;  %1351 = vmatprep.subr.bf16.mxu1 %v2236_v26  ;;  %v2230_v16 = vcombine.high %v996_v6, %v1000_v7  ;;  %v988_v18 = vld [vmem:[#allocation3 + $0xc8] sm:$0xff]  ;;  %v2229_v25 = vcombine.low %v996_v6, %v1000_v7  ;;  %v1021_v6 = vld [vmem:[#allocation3 + $0x1d0] sm:$0xff] }
 0x113   : > { %2330 = vmatmul.mubr.msk.bf16.gmra.mxu1 %vm633_vm2, %v589_v55  ;;  %v992_v19 = vld [vmem:[#allocation3 + $0xe8] sm:$0xff]  ;;  %v1025_v7 = vld [vmem:[#allocation3 + $0x1f0] sm:$0xff] }
 0x114   : > { %2333 = vmatprep.mubr.msk.bf16.mxu1 %vm633_vm2, %v590_v59  ;;  %v1004_v59 = vld [vmem:[#allocation3 + $0x148] sm:$0xff]  ;;  %v2222_v27 = vcombine.high %v988_v18, %v992_v19 }
 0x115   : > { %1352 = vmatpush1.bf16.msra.mxu1 %v2235_v29  ;;  %v2238_v3 = vcombine.high %v1004_v59, %v1008_v60  ;;  %v2237_v13 = vcombine.low %v1004_v59, %v1008_v60  ;;  %v984_v50 = vld [vmem:[#allocation3 + $0xa8] sm:$0xff] }
 0x116   : > { %1353 = vmatprep.subr.bf16.mxu1 %v2228_v30 }
 0x119   : > { %1354 = vmatpush1.bf16.msra.mxu1 %v2227_v33 }
 0x11a   : > { %1355 = vmatprep.subr.bf16.mxu1 %v2220_v34  ;;  %v2221_v34 = vcombine.low %v988_v18, %v992_v19 }
 0x11b   : > { %2334 = vmatmul.mubr.msk.bf16.gmra.mxu1 %vm633_vm2, %v591_v2 }
 0x11c   : > { %2337 = vmatprep.mubr.msk.bf16.mxu1 %vm633_vm2, %v592_v5 }
 0x11d   : > { %1356 = vmatpush1.bf16.msra.mxu1 %v2219_v35 }
 0x123   : > { %2338 = vmatmul.mubr.msk.bf16.gmra.mxu1 %vm633_vm2, %v593_v8 }
 0x1cb   : > { %v2327_v36 = vpop.f32.mrf.mxu1 }
 0x1cc   : > { %v701_v42 = vadd.f32 %v2327_v36, %v2817_v38 }
 0x1cd   : > { %v692_v37 = vpop.f32.mrf.mxu1 }
 0x1ce   : > { %v693_v40 = vadd.f32 %v2817_v38, %v692_v37  ;;  %v757_v51 = vmax.f32 %v701_v42, 0.0 }
 0x1cf   : > { %v2328_v39 = vpop.f32.mrf.mxu1 }
 0x1d0   : > { %v704_v41 = vadd.f32 %v2328_v39, %v2817_v38  ;;  %v755_v47 = vmax.f32 %v693_v40, 0.0 }
 0x1d1   : > { %v695_v43 = vpop.f32.mrf.mxu1 }
 0x1d2   : > { %v696_v44 = vadd.f32 %v2817_v38, %v695_v43  ;;  %v758_v45 = vmax.f32 %v704_v41, 0.0 }
 0x1d3   : > { %v2331_v46 = vpop.f32.mrf.mxu1 }
 0x1d4   : > { %v756_v48 = vmax.f32 %v696_v44, 0.0  ;;  %v772_v54 = vpack.c.bf16 %v758_v45, %v757_v51  ;;  %v717_v61 = vadd.f32 %v2331_v46, %v2817_v38  ;;  %v979_v46 = vld [vmem:[#allocation3 + $0x80] sm:$0xff] }
 0x1d5   : > { %v708_v52 = vpop.f32.mrf.mxu1 }
 0x1d6   : > { %v771_v53 = vpack.c.bf16 %v756_v48, %v755_v47  ;;  %v709_v57 = vadd.f32 %v2817_v38, %v708_v52  ;;  %v761_v8 = vmax.f32 %v717_v61, 0.0  ;;  %v983_v47 = vld [vmem:[#allocation3 + $0xa0] sm:$0xff]  ;;  %v980_v48 = vld [vmem:[#allocation3 + $0x88] sm:$0xff] }
 0x1d7   : > { %v2332_v55 = vpop.f32.mrf.mxu1  ;;  %v2212_v49 = vcombine.high %v979_v46, %v983_v47  ;;  %v2211_v51 = vcombine.low %v979_v46, %v983_v47  ;;  %v2213_v52 = vcombine.low %v980_v48, %v984_v50  ;;  %v963_v61 = vld [vmem:[#allocation3] sm:$0xff]  ;;  %v997_v46 = vld [vmem:[#allocation3 + $0x110] sm:$0xff] }
 0x1d8   : > { %v720_v58 = vadd.f32 %v2332_v55, %v2817_v38  ;;  %2349 = vmatprep.mubr.msk.bf16.mxu0 %vm633_vm2, %v771_v53  ;;  %v759_v4 = vmax.f32 %v709_v57, 0.0  ;;  %v2214_v53 = vcombine.high %v980_v48, %v984_v50  ;;  %v972_v55 = vld [vmem:[#allocation3 + $0x48] sm:$0xff]  ;;  %v1001_v48 = vld [vmem:[#allocation3 + $0x130] sm:$0xff]  ;;  %v1002_v50 = vld [vmem:[#allocation3 + $0x138] sm:$0xff] }
 0x1d9   : > { %v711_v62 = vpop.f32.mrf.mxu1  ;;  %2350 = vmatmul.mubr.msk.bf16.vlgmr.msra.gmra.mxu0 %vm633_vm2, %v772_v54  ;;  %1357 = vmatprep.subr.bf16.mxu1 %v2212_v49  ;;  %v975_v54 = vld [vmem:[#allocation3 + $0x60] sm:$0xff]  ;;  %v976_v57 = vld [vmem:[#allocation3 + $0x68] sm:$0xff]  ;;  %v998_v49 = vld [vmem:[#allocation3 + $0x118] sm:$0xff] }
 0x1da   : > { %v712_v63 = vadd.f32 %v2817_v38, %v711_v62  ;;  %1461 = vmatpush1.bf16.msra.mxu0 %v2253_v20  ;;  %v762_v1 = vmax.f32 %v720_v58, 0.0  ;;  %1358 = vmatpush1.bf16.msra.mxu1 %v2211_v51  ;;  %v2205_v59 = vcombine.low %v972_v55, %v976_v57  ;;  %v2206_v60 = vcombine.high %v972_v55, %v976_v57  ;;  %v967_v62 = vld [vmem:[#allocation3 + $0x20] sm:$0xff]  ;;  %v989_v57 = vld [vmem:[#allocation3 + $0xd0] sm:$0xff] }
 0x1db   : > { %v2335_v2 = vpop.f32.mrf.mxu1  ;;  %1462 = vmatprep.subr.bf16.mxu0 %v2246_v56  ;;  %v2232_v55 = vcombine.high %v997_v46, %v1001_v48 }
 0x1dc   : > { %v760_v5 = vmax.f32 %v712_v63, 0.0  ;;  %v733_v9 = vadd.f32 %v2335_v2, %v2817_v38  ;;  %v774_v14 = vpack.c.bf16 %v762_v1, %v761_v8  ;;  %v964_v63 = vld [vmem:[#allocation3 + $0x8] sm:$0xff]  ;;  %v2195_v2 = vcombine.low %v963_v61, %v967_v62  ;;  %v1022_v8 = vld [vmem:[#allocation3 + $0x1d8] sm:$0xff] }
 0x1dd   : > { %v724_v10 = vpop.f32.mrf.mxu1  ;;  %v968_v1 = vld [vmem:[#allocation3 + $0x28] sm:$0xff] }
 0x1de   : > { %v773_v11 = vpack.c.bf16 %v760_v5, %v759_v4  ;;  %v725_v12 = vadd.f32 %v2817_v38, %v724_v10  ;;  %1463 = vmatpush1.bf16.msra.mxu0 %v2245_v0  ;;  %v765_v20 = vmax.f32 %v733_v9, 0.0  ;;  %v2196_v0 = vcombine.high %v963_v61, %v967_v62  ;;  %v994_v61 = vld [vmem:[#allocation3 + $0xf8] sm:$0xff] }
 0x1df   : > { %v2336_v15 = vpop.f32.mrf.mxu1  ;;  %1464 = vmatprep.subr.bf16.mxu0 %v2238_v3  ;;  %v2197_v3 = vcombine.low %v964_v63, %v968_v1  ;;  %v2198_v4 = vcombine.high %v964_v63, %v968_v1  ;;  %v2600_v5 = vmov 0   ;;  %v2255_v9 = vcombine.low %v1021_v6, %v1025_v7 }
 0x1e0   : > { %v736_v17 = vadd.f32 %v2336_v15, %v2817_v38  ;;  %2353 = vmatprep.mubr.msk.bf16.mxu0 %vm633_vm2, %v773_v11  ;;  %v763_v22 = vmax.f32 %v725_v12, 0.0  ;;  %1379 = vmatprep.mubr.bf16.mxu1 %v2600_v5  ;;  %v2256_v10 = vcombine.high %v1021_v6, %v1025_v7  ;;  %v1026_v11 = vld [vmem:[#allocation3 + $0x1f8] sm:$0xff]  ;;  %v2231_v63 = vcombine.low %v997_v46, %v1001_v48  ;;  %v985_v7 = vld [vmem:[#allocation3 + $0xb0] sm:$0xff] }
 0x1e1   : > { %v727_v21 = vpop.f32.mrf.mxu1  ;;  %2354 = vmatmul.mubr.msk.bf16.gmra.mxu0 %vm633_vm2, %v774_v14  ;;  %v2257_v12 = vcombine.low %v1022_v8, %v1026_v11 }
 0x1e2   : > { %v766_v23 = vmax.f32 %v736_v17, 0.0  ;;  %v728_v24 = vadd.f32 %v2817_v38, %v727_v21  ;;  %1465 = vmatpush1.bf16.msra.mxu0 %v2237_v13  ;;  %v2258_v13 = vcombine.high %v1022_v8, %v1026_v11  ;;  %v982_v8 = vld [vmem:[#allocation3 + $0x98] sm:$0xff] }
 0x1e3   : > { %v2339_v26 = vpop.f32.mrf.mxu1  ;;  %1466 = vmatprep.subr.bf16.mxu0 %v2230_v16  ;;  %v2848_v16 = vld [vmem:[%s3015_s6] ss:$0 sm:$0xff] }
 0x1e4   : > { %v764_v28 = vmax.f32 %v728_v24, 0.0  ;;  %v776_v29 = vpack.c.bf16 %v766_v23, %v765_v20  ;;  %v749_v30 = vadd.f32 %v2339_v26, %v2817_v38  ;;  %v1014_v26 = vld [vmem:[#allocation3 + $0x198] sm:$0xff] }
 0x1e5   : > { %v740_v31 = vpop.f32.mrf.mxu1 }
 0x1e6   : > { %v775_v32 = vpack.c.bf16 %v764_v28, %v763_v22  ;;  %v741_v33 = vadd.f32 %v2817_v38, %v740_v31  ;;  %1467 = vmatpush1.bf16.msra.mxu0 %v2229_v25  ;;  %v769_v37 = vmax.f32 %v749_v30, 0.0  ;;  %v1013_v22 = vld [vmem:[#allocation3 + $0x190] sm:$0xff] }
 0x1e7   : > { %v2340_v35 = vpop.f32.mrf.mxu1  ;;  %1468 = vmatprep.subr.bf16.mxu0 %v2222_v27  ;;  %v1017_v25 = vld [vmem:[#allocation3 + $0x1b0] sm:$0xff]  ;;  %v1018_v27 = vld [vmem:[#allocation3 + $0x1b8] sm:$0xff] }
 0x1e8   : > { %2357 = vmatprep.mubr.msk.bf16.mxu0 %vm633_vm2, %v775_v32  ;;  %v752_v36 = vadd.f32 %v2340_v35, %v2817_v38  ;;  %v767_v40 = vmax.f32 %v741_v33, 0.0  ;;  %v1005_v31 = vld [vmem:[#allocation3 + $0x150] sm:$0xff]  ;;  %v2248_v33 = vcombine.high %v1013_v22, %v1017_v25 }
 0x1e9   : > { %2358 = vmatmul.mubr.msk.bf16.gmra.mxu0 %vm633_vm2, %v776_v29  ;;  %v743_v39 = vpop.f32.mrf.mxu1  ;;  %v1009_v35 = vld [vmem:[#allocation3 + $0x170] sm:$0xff] }
 0x1ea   : > { %v770_v41 = vmax.f32 %v752_v36, 0.0  ;;  %v744_v42 = vadd.f32 %v2817_v38, %v743_v39  ;;  %1469 = vmatpush1.bf16.msra.mxu0 %v2221_v34  ;;  %v971_v38 = vld [vmem:[#allocation3 + $0x40] sm:$0xff]  ;;  %v2250_v34 = vcombine.high %v1014_v26, %v1018_v27  ;;  %v1006_v36 = vld [vmem:[#allocation3 + $0x158] sm:$0xff]  ;;  %v2239_v51 = vcombine.low %v1005_v31, %v1009_v35 }
 0x1eb   : > { %1470 = vmatprep.subr.bf16.mxu0 %v2214_v53  ;;  %v2204_v56 = vcombine.high %v971_v38, %v975_v54  ;;  %v2203_v58 = vcombine.low %v971_v38, %v975_v54 }
 0x1ec   : > { %v768_v43 = vmax.f32 %v744_v42, 0.0  ;;  %v778_v44 = vpack.c.bf16 %v770_v41, %v769_v37  ;;  %v1010_v37 = vld [vmem:[#allocation3 + $0x178] sm:$0xff]  ;;  %v2249_v41 = vcombine.low %v1014_v26, %v1018_v27 }
 0x1ed   : > { %1359 = vmatprep.subr.bf16.mxu1 %v2204_v56  ;;  %v2241_v38 = vcombine.low %v1006_v36, %v1010_v37  ;;  %v2234_v56 = vcombine.high %v998_v49, %v1002_v50 }
 0x1ee   : > { %v777_v45 = vpack.c.bf16 %v768_v43, %v767_v40  ;;  %1471 = vmatpush1.bf16.msra.mxu0 %v2213_v52  ;;  %1360 = vmatpush1.bf16.msra.mxu1 %v2203_v58  ;;  %v2247_v40 = vcombine.low %v1013_v22, %v1017_v25  ;;  %v2240_v43 = vcombine.high %v1005_v31, %v1009_v35  ;;  %v974_v22 = vld [vmem:[#allocation3 + $0x58] sm:$0xff] }
 0x1ef   : > { %1472 = vmatprep.subr.bf16.mxu0 %v2206_v60  ;;  %1361 = vmatprep.subr.bf16.mxu1 %v2196_v0  ;;  %v990_v60 = vld [vmem:[#allocation3 + $0xd8] sm:$0xff]  ;;  %v2233_v0 = vcombine.low %v998_v49, %v1002_v50 }
 0x1f0   : > { %2361 = vmatprep.mubr.msk.bf16.mxu0 %vm633_vm2, %v777_v45 }
 0x1f1   : > { %2362 = vmatmul.mubr.msk.bf16.gmra.mxu0 %vm633_vm2, %v778_v44  ;;  %v2242_v44 = vcombine.high %v1006_v36, %v1010_v37 }
 0x1f2   : > { %1473 = vmatpush1.bf16.msra.mxu0 %v2205_v59  ;;  %1362 = vmatpush1.bf16.msra.mxu1 %v2195_v2  ;;  %v993_v59 = vld [vmem:[#allocation3 + $0xf0] sm:$0xff] }
 0x1f3   : > { %1474 = vmatprep.subr.bf16.mxu0 %v2198_v4  ;;  %1492 = vmatprep.mubr.bf16.mxu0 %v2600_v5  ;;  %v2224_v2 = vcombine.high %v989_v57, %v993_v59  ;;  %v981_v4 = vld [vmem:[#allocation3 + $0x90] sm:$0xff] }
 0x1f4   : > { %1573 = vmatprep.subr.bf16.mxu1 %v2256_v10  ;;  %v2223_v10 = vcombine.low %v989_v57, %v993_v59  ;;  %v2215_v25 = vcombine.low %v981_v4, %v985_v7 }
 0x1f6   : > { %1475 = vmatpush1.bf16.msra.mxu0 %v2197_v3  ;;  %v2226_v3 = vcombine.high %v990_v60, %v994_v61 }
 0x1f7   : > { %1686 = vmatprep.subr.bf16.mxu0 %v2258_v13  ;;  %v2225_v13 = vcombine.low %v990_v60, %v994_v61 }
 0x299   : > { %v2351_v14 = vpop.f32.mrf.mxu0 }
 0x29a   : > { %v885_v39 = vadd.f32 %v2351_v14, %v2848_v16 }
 0x29b   : > { %v876_v15 = vpop.f32.mrf.mxu0 }
 0x29c   : > { %v877_v18 = vadd.f32 %v2848_v16, %v876_v15  ;;  %v941_v47 = vmax.f32 %v885_v39, 0.0  ;;  %v2216_v15 = vcombine.high %v981_v4, %v985_v7 }
 0x29d   : > { %v2352_v17 = vpop.f32.mrf.mxu0 }
 0x29e   : > { %v939_v23 = vmax.f32 %v877_v18, 0.0  ;;  %v888_v29 = vadd.f32 %v2352_v17, %v2848_v16  ;;  %v973_v18 = vld [vmem:[#allocation3 + $0x50] sm:$0xff] }
 0x29f   : > { %v879_v19 = vpop.f32.mrf.mxu0 }
 0x2a0   : > { %v880_v20 = vadd.f32 %v2848_v16, %v879_v19  ;;  %v942_v42 = vmax.f32 %v888_v29, 0.0  ;;  %v965_v29 = vld [vmem:[#allocation3 + $0x10] sm:$0xff] }
 0x2a1   : > { %v2852_v21 = vpop.f32.mrf.mxu0 }
 0x2a2   : > { %v940_v24 = vmax.f32 %v880_v20, 0.0  ;;  %v2862_v52 = vpack.c.bf16 %v942_v42, %v941_v47  ;;  %v901_v19 = vadd.f32 %v2852_v21, %v2848_v16  ;;  %v977_v20 = vld [vmem:[#allocation3 + $0x70] sm:$0xff] }
 0x2a3   : > { %v892_v28 = vpop.f32.mrf.mxu0  ;;  %v2208_v21 = vcombine.high %v973_v18, %v977_v20  ;;  %v2207_v35 = vcombine.low %v973_v18, %v977_v20 }
 0x2a4   : > { %v2855_v30 = vpack.c.bf16 %v940_v24, %v939_v23  ;;  %v893_v58 = vadd.f32 %v2848_v16, %v892_v28  ;;  %v978_v23 = vld [vmem:[#allocation3 + $0x78] sm:$0xff]  ;;  %v945_v31 = vmax.f32 %v901_v19, 0.0 }
 0x2a5   : > { %v2356_v32 = vpop.f32.mrf.mxu0  ;;  %v2210_v28 = vcombine.high %v974_v22, %v978_v23  ;;  %v2209_v39 = vcombine.low %v974_v22, %v978_v23 }
 0x2a6   : > { %1380 = vmatmul.mubr.bf16.vlgmr.msra.gmra.mxu1 %v2855_v30  ;;  %1493 = vmatmul.mubr.bf16.vlgmr.msra.gmra.mxu0 %v2855_v30  ;;  %v943_v6 = vmax.f32 %v893_v58, 0.0  ;;  %v904_v11 = vadd.f32 %v2356_v32, %v2848_v16  ;;  %v969_v32 = vld [vmem:[#allocation3 + $0x30] sm:$0xff] }
 0x2a7   : > { %1574 = vmatpush1.bf16.msra.mxu1 %v2255_v9  ;;  %1687 = vmatpush1.bf16.msra.mxu0 %v2257_v12  ;;  %v895_v45 = vpop.f32.mrf.mxu0  ;;  %v986_v9 = vld [vmem:[#allocation3 + $0xb8] sm:$0xff] }
 0x2a8   : > { %1389 = vmatprep.mubr.bf16.mxu1 %v2600_v5  ;;  %1502 = vmatprep.mubr.bf16.mxu0 %v2600_v5  ;;  %v896_v53 = vadd.f32 %v2848_v16, %v895_v45  ;;  %v2218_v17 = vcombine.high %v982_v8, %v986_v9  ;;  %v946_v24 = vmax.f32 %v904_v11, 0.0  ;;  %v2217_v26 = vcombine.low %v982_v8, %v986_v9 }
 0x2a9   : > { %1575 = vmatprep.subr.bf16.mxu1 %v2248_v33  ;;  %1688 = vmatprep.subr.bf16.mxu0 %v2250_v34  ;;  %v2865_v54 = vpop.f32.mrf.mxu0  ;;  %v966_v33 = vld [vmem:[#allocation3 + $0x18] sm:$0xff]  ;;  %v2199_v45 = vcombine.low %v965_v29, %v969_v32 }
 0x2aa   : > { %v944_v62 = vmax.f32 %v896_v53, 0.0  ;;  %v970_v34 = vld [vmem:[#allocation3 + $0x38] sm:$0xff]  ;;  %v2881_v36 = vpack.c.bf16 %v946_v24, %v945_v31  ;;  %v917_v53 = vadd.f32 %v2865_v54, %v2848_v16 }
 0x2ab   : > { %1576 = vmatpush1.bf16.msra.mxu1 %v2247_v40  ;;  %1689 = vmatpush1.bf16.msra.mxu0 %v2249_v41  ;;  %v908_v1 = vpop.f32.mrf.mxu0  ;;  %v2200_v41 = vcombine.high %v965_v29, %v969_v32  ;;  %v2202_v42 = vcombine.high %v966_v33, %v970_v34  ;;  %v2201_v46 = vcombine.low %v966_v33, %v970_v34 }
 0x2ac   : > { %1577 = vmatprep.subr.bf16.mxu1 %v2240_v43  ;;  %1690 = vmatprep.subr.bf16.mxu0 %v2242_v44  ;;  %v2873_v12 = vpack.c.bf16 %v944_v62, %v943_v6  ;;  %v909_v43 = vadd.f32 %v2848_v16, %v908_v1 }
 0x2ad   : > { %v2360_v14 = vpop.f32.mrf.mxu0 }
 0x2ae   : > { %1390 = vmatmul.mubr.bf16.gmra.mxu1 %v2862_v52  ;;  %1503 = vmatmul.mubr.bf16.gmra.mxu0 %v2862_v52  ;;  %v947_v48 = vmax.f32 %v909_v43, 0.0  ;;  %v920_v49 = vadd.f32 %v2360_v14, %v2848_v16 }
 0x2af   : > { %1399 = vmatprep.mubr.bf16.mxu1 %v2600_v5  ;;  %1512 = vmatprep.mubr.bf16.mxu0 %v2600_v5  ;;  %v911_v27 = vpop.f32.mrf.mxu0 }
 0x2b0   : > { %1578 = vmatpush1.bf16.msra.mxu1 %v2239_v51  ;;  %1691 = vmatpush1.bf16.msra.mxu0 %v2241_v38  ;;  %v912_v37 = vadd.f32 %v2848_v16, %v911_v27  ;;  %v950_v38 = vmax.f32 %v920_v49, 0.0 }
 0x2b1   : > { %1579 = vmatprep.subr.bf16.mxu1 %v2232_v55  ;;  %1692 = vmatprep.subr.bf16.mxu0 %v2234_v56  ;;  %v2363_v40 = vpop.f32.mrf.mxu0  ;;  %v949_v56 = vmax.f32 %v917_v53, 0.0 }
 0x2b2   : > { %v948_v44 = vmax.f32 %v912_v37, 0.0  ;;  %v933_v61 = vadd.f32 %v2363_v40, %v2848_v16 }
 0x2b3   : > { %v924_v47 = vpop.f32.mrf.mxu0  ;;  %v960_v57 = vpack.c.bf16 %v950_v38, %v949_v56 }
 0x2b4   : > { %1580 = vmatpush1.bf16.msra.mxu1 %v2231_v63  ;;  %1693 = vmatpush1.bf16.msra.mxu0 %v2233_v0  ;;  %v959_v50 = vpack.c.bf16 %v948_v44, %v947_v48  ;;  %v925_v58 = vadd.f32 %v2848_v16, %v924_v47  ;;  %v953_v0 = vmax.f32 %v933_v61, 0.0 }
 0x2b5   : > { %1581 = vmatprep.subr.bf16.mxu1 %v2224_v2  ;;  %1694 = vmatprep.subr.bf16.mxu0 %v2226_v3  ;;  %v2364_v51 = vpop.f32.mrf.mxu0 }
 0x2b6   : > { %1400 = vmatmul.mubr.bf16.gmra.mxu1 %v2873_v12  ;;  %1513 = vmatmul.mubr.bf16.gmra.mxu0 %v2873_v12  ;;  %v951_v54 = vmax.f32 %v925_v58, 0.0  ;;  %v936_v62 = vadd.f32 %v2364_v51, %v2848_v16 }
 0x2b7   : > { %1409 = vmatprep.mubr.bf16.mxu1 %v2600_v5  ;;  %1522 = vmatprep.mubr.bf16.mxu0 %v2600_v5  ;;  %v927_v55 = vpop.f32.mrf.mxu0 }
 0x2b8   : > { %1582 = vmatpush1.bf16.msra.mxu1 %v2223_v10  ;;  %1695 = vmatpush1.bf16.msra.mxu0 %v2225_v13  ;;  %v928_v59 = vadd.f32 %v2848_v16, %v927_v55  ;;  %v954_v1 = vmax.f32 %v936_v62, 0.0 }
 0x2b9   : > { %1583 = vmatprep.subr.bf16.mxu1 %v2216_v15  ;;  %1696 = vmatprep.subr.bf16.mxu0 %v2218_v17 }
 0x2ba   : > { %v952_v60 = vmax.f32 %v928_v59, 0.0  ;;  %v962_v2 = vpack.c.bf16 %v954_v1, %v953_v0 }
 0x2bc   : > { %1584 = vmatpush1.bf16.msra.mxu1 %v2215_v25  ;;  %1697 = vmatpush1.bf16.msra.mxu0 %v2217_v26  ;;  %v961_v63 = vpack.c.bf16 %v952_v60, %v951_v54 }
 0x2bd   : > { %1585 = vmatprep.subr.bf16.mxu1 %v2208_v21  ;;  %1698 = vmatprep.subr.bf16.mxu0 %v2210_v28 }
 0x2be   : > { %1410 = vmatmul.mubr.bf16.gmra.mxu1 %v2881_v36  ;;  %1523 = vmatmul.mubr.bf16.gmra.mxu0 %v2881_v36 }
 0x2bf   : > { %1419 = vmatprep.mubr.bf16.mxu1 %v2600_v5  ;;  %1532 = vmatprep.mubr.bf16.mxu0 %v2600_v5 }
 0x2c0   : > { %1586 = vmatpush1.bf16.msra.mxu1 %v2207_v35  ;;  %1699 = vmatpush1.bf16.msra.mxu0 %v2209_v39 }
 0x2c1   : > { %1587 = vmatprep.subr.bf16.mxu1 %v2200_v41  ;;  %1700 = vmatprep.subr.bf16.mxu0 %v2202_v42 }
 0x2c4   : > { %1588 = vmatpush1.bf16.msra.mxu1 %v2199_v45  ;;  %1701 = vmatpush1.bf16.msra.mxu0 %v2201_v46 }
 0x2c6   : > { %1420 = vmatmul.mubr.bf16.gmra.mxu1 %v959_v50  ;;  %1533 = vmatmul.mubr.bf16.gmra.mxu0 %v959_v50 }
 0x2c7   : > { %1429 = vmatprep.mubr.bf16.mxu1 %v2600_v5  ;;  %1542 = vmatprep.mubr.bf16.mxu0 %v2600_v5 }
 0x2ce   : > { %1430 = vmatmul.mubr.bf16.gmra.mxu1 %v960_v57  ;;  %1543 = vmatmul.mubr.bf16.gmra.mxu0 %v960_v57 }
 0x2cf   : > { %1439 = vmatprep.mubr.bf16.mxu1 %v2600_v5  ;;  %1552 = vmatprep.mubr.bf16.mxu0 %v2600_v5 }
 0x2d6   : > { %1440 = vmatmul.mubr.bf16.gmra.mxu1 %v961_v63  ;;  %1553 = vmatmul.mubr.bf16.gmra.mxu0 %v961_v63 }
 0x2d7   : > { %1449 = vmatprep.mubr.bf16.mxu1 %v2600_v5  ;;  %1562 = vmatprep.mubr.bf16.mxu0 %v2600_v5 }
 0x2de   : > { %1450 = vmatmul.mubr.bf16.gmra.mxu1 %v962_v2  ;;  %1563 = vmatmul.mubr.bf16.gmra.mxu0 %v962_v2 }
 0x2df   : > { %1605 = vmatprep.mubr.bf16.mxu1 %v2600_v5  ;;  %1718 = vmatprep.mubr.bf16.mxu0 %v2600_v5 }
 0x2e6   : > { %1606 = vmatmul.mubr.bf16.vlgmr.msra.gmra.mxu1 %v2855_v30  ;;  %1719 = vmatmul.mubr.bf16.vlgmr.msra.gmra.mxu0 %v2855_v30 }
 0x2e7   : > { %1615 = vmatprep.mubr.bf16.mxu1 %v2600_v5  ;;  %1728 = vmatprep.mubr.bf16.mxu0 %v2600_v5 }
 0x2ee   : > { %1616 = vmatmul.mubr.bf16.gmra.mxu1 %v2862_v52  ;;  %1729 = vmatmul.mubr.bf16.gmra.mxu0 %v2862_v52 }
 0x2ef   : > { %1625 = vmatprep.mubr.bf16.mxu1 %v2600_v5  ;;  %1738 = vmatprep.mubr.bf16.mxu0 %v2600_v5 }
 0x2f6   : > { %1626 = vmatmul.mubr.bf16.gmra.mxu1 %v2873_v12  ;;  %1739 = vmatmul.mubr.bf16.gmra.mxu0 %v2873_v12 }
 0x2f7   : > { %1635 = vmatprep.mubr.bf16.mxu1 %v2600_v5  ;;  %1748 = vmatprep.mubr.bf16.mxu0 %v2600_v5 }
 0x2fe   : > { %1636 = vmatmul.mubr.bf16.gmra.mxu1 %v2881_v36  ;;  %1749 = vmatmul.mubr.bf16.gmra.mxu0 %v2881_v36 }
 0x2ff   : > { %1645 = vmatprep.mubr.bf16.mxu1 %v2600_v5  ;;  %1758 = vmatprep.mubr.bf16.mxu0 %v2600_v5 }
 0x306   : > { %1646 = vmatmul.mubr.bf16.gmra.mxu1 %v959_v50  ;;  %1759 = vmatmul.mubr.bf16.gmra.mxu0 %v959_v50 }
 0x307   : > { %1655 = vmatprep.mubr.bf16.mxu1 %v2600_v5  ;;  %1768 = vmatprep.mubr.bf16.mxu0 %v2600_v5 }
 0x30e   : > { %1656 = vmatmul.mubr.bf16.gmra.mxu1 %v960_v57  ;;  %1769 = vmatmul.mubr.bf16.gmra.mxu0 %v960_v57 }
 0x30f   : > { %1665 = vmatprep.mubr.bf16.mxu1 %v2600_v5  ;;  %1778 = vmatprep.mubr.bf16.mxu0 %v2600_v5 }
 0x316   : > { %1666 = vmatmul.mubr.bf16.gmra.mxu1 %v961_v63  ;;  %1779 = vmatmul.mubr.bf16.gmra.mxu0 %v961_v63 }
 0x317   : > { %1675 = vmatprep.mubr.bf16.mxu1 %v2600_v5  ;;  %1788 = vmatprep.mubr.bf16.mxu0 %v2600_v5 }
 0x31e   : > { %1676 = vmatmul.mubr.bf16.gmra.mxu1 %v962_v2  ;;  %1789 = vmatmul.mubr.bf16.gmra.mxu0 %v962_v2 }
 0x366   : > { %v1381_v16 = vpop.f32.mrf.mxu1  ;;  %v1494_v30 = vpop.f32.mrf.mxu0 }
 0x368   : > { %v1383_v52 = vpop.f32.mrf.mxu1  ;;  %v1496_v3 = vpop.f32.mrf.mxu0 }
 0x36a   : > { %v1385_v4 = vpop.f32.mrf.mxu1  ;;  %v1498_v6 = vpop.f32.mrf.mxu0 }
 0x36b   : > { %v1800_v7 = vmax.f32 %v1381_v16, %v1385_v4  ;;  %v1842_v8 = vmax.f32 %v1494_v30, %v1498_v6 }
 0x36c   : > { %v1387_v9 = vpop.f32.mrf.mxu1  ;;  %v1500_v10 = vpop.f32.mrf.mxu0 }
 0x36d   : > { %v1821_v11 = vmax.f32 %v1383_v52, %v1387_v9  ;;  %v1863_v12 = vmax.f32 %v1496_v3, %v1500_v10 }
 0x36e   : > { %v1391_v13 = vpop.f32.mrf.mxu1  ;;  %v1504_v14 = vpop.f32.mrf.mxu0 }
 0x36f   : > { %v1801_v15 = vmax.f32 %v1800_v7, %v1391_v13  ;;  %v1843_v17 = vmax.f32 %v1842_v8, %v1504_v14 }
 0x370   : > { %v1393_v18 = vpop.f32.mrf.mxu1  ;;  %v1506_v5 = vpop.f32.mrf.mxu0 }
 0x371   : > { %v1822_v19 = vmax.f32 %v1821_v11, %v1393_v18  ;;  %v1864_v20 = vmax.f32 %v1863_v12, %v1506_v5 }
 0x372   : > { %v1395_v22 = vpop.f32.mrf.mxu1  ;;  %v1508_v23 = vpop.f32.mrf.mxu0 }
 0x373   : > { %v1802_v24 = vmax.f32 %v1801_v15, %v1395_v22  ;;  %v1844_v25 = vmax.f32 %v1843_v17, %v1508_v23 }
 0x374   : > { %v1397_v26 = vpop.f32.mrf.mxu1  ;;  %v1510_v27 = vpop.f32.mrf.mxu0 }
 0x375   : > { %v1823_v21 = vmax.f32 %v1822_v19, %v1397_v26  ;;  %v1865_v28 = vmax.f32 %v1864_v20, %v1510_v27 }
 0x376   : > { %v1401_v29 = vpop.f32.mrf.mxu1  ;;  %v1514_v31 = vpop.f32.mrf.mxu0 }
 0x377   : > { %v1803_v32 = vmax.f32 %v1802_v24, %v1401_v29  ;;  %v1845_v33 = vmax.f32 %v1844_v25, %v1514_v31 }
 0x378   : > { %v1403_v34 = vpop.f32.mrf.mxu1  ;;  %v1516_v35 = vpop.f32.mrf.mxu0 }
 0x379   : > { %v1824_v36 = vmax.f32 %v1823_v21, %v1403_v34  ;;  %v1866_v37 = vmax.f32 %v1865_v28, %v1516_v35 }
 0x37a   : > { %v1405_v39 = vpop.f32.mrf.mxu1  ;;  %v1518_v40 = vpop.f32.mrf.mxu0 }
 0x37b   : > { %v1804_v41 = vmax.f32 %v1803_v32, %v1405_v39  ;;  %v1846_v42 = vmax.f32 %v1845_v33, %v1518_v40 }
 0x37c   : > { %v1407_v43 = vpop.f32.mrf.mxu1  ;;  %v1520_v44 = vpop.f32.mrf.mxu0 }
 0x37d   : > { %v1825_v45 = vmax.f32 %v1824_v36, %v1407_v43  ;;  %v1867_v46 = vmax.f32 %v1866_v37, %v1520_v44 }
 0x37e   : > { %v1411_v47 = vpop.f32.mrf.mxu1  ;;  %v1524_v48 = vpop.f32.mrf.mxu0 }
 0x37f   : > { %v1805_v49 = vmax.f32 %v1804_v41, %v1411_v47  ;;  %v1847_v50 = vmax.f32 %v1846_v42, %v1524_v48 }
 0x380   : > { %v1413_v51 = vpop.f32.mrf.mxu1  ;;  %v1526_v53 = vpop.f32.mrf.mxu0 }
 0x381   : > { %v1826_v38 = vmax.f32 %v1825_v45, %v1413_v51  ;;  %v1868_v55 = vmax.f32 %v1867_v46, %v1526_v53 }
 0x382   : > { %v1415_v56 = vpop.f32.mrf.mxu1  ;;  %v1528_v57 = vpop.f32.mrf.mxu0 }
 0x383   : > { %v1806_v58 = vmax.f32 %v1805_v49, %v1415_v56  ;;  %v1848_v59 = vmax.f32 %v1847_v50, %v1528_v57 }
 0x384   : > { %v1417_v54 = vpop.f32.mrf.mxu1  ;;  %v1530_v60 = vpop.f32.mrf.mxu0 }
 0x385   : > { %v1827_v61 = vmax.f32 %v1826_v38, %v1417_v54  ;;  %v1869_v62 = vmax.f32 %v1868_v55, %v1530_v60 }
 0x386   : > { %v1421_v63 = vpop.f32.mrf.mxu1  ;;  %v1534_v0 = vpop.f32.mrf.mxu0 }
 0x387   : > { %v1807_v1 = vmax.f32 %v1806_v58, %v1421_v63  ;;  %v1849_v2 = vmax.f32 %v1848_v59, %v1534_v0 }
 0x388   : > { %v1423_v16 = vpop.f32.mrf.mxu1  ;;  %v1536_v30 = vpop.f32.mrf.mxu0 }
 0x389   : > { %v1828_v52 = vmax.f32 %v1827_v61, %v1423_v16  ;;  %v1870_v3 = vmax.f32 %v1869_v62, %v1536_v30 }
 0x38a   : > { %v1425_v4 = vpop.f32.mrf.mxu1  ;;  %v1538_v6 = vpop.f32.mrf.mxu0 }
 0x38b   : > { %v1808_v7 = vmax.f32 %v1807_v1, %v1425_v4  ;;  %v1850_v8 = vmax.f32 %v1849_v2, %v1538_v6  ;;  %v2601_v4 = vmov 1966171168  }
 0x38c   : > { %v1427_v9 = vpop.f32.mrf.mxu1  ;;  %v1540_v10 = vpop.f32.mrf.mxu0  ;;  %v1981_v6 = vunpack.c.l.s4 %v2601_v4 }
 0x38d   : > { %v1829_v11 = vmax.f32 %v1828_v52, %v1427_v9  ;;  %v1871_v12 = vmax.f32 %v1870_v3, %v1540_v10 }
 0x38e   : > { %v1431_v13 = vpop.f32.mrf.mxu1  ;;  %v1544_v14 = vpop.f32.mrf.mxu0 }
 0x38f   : > { %v1809_v15 = vmax.f32 %v1808_v7, %v1431_v13  ;;  %v1851_v17 = vmax.f32 %v1850_v8, %v1544_v14  ;;  %v1983_v7 = vlaneseq }
 0x390   : > { %v1433_v18 = vpop.f32.mrf.mxu1  ;;  %v1546_v5 = vpop.f32.mrf.mxu0 }
 0x391   : > { %v1830_v19 = vmax.f32 %v1829_v11, %v1433_v18  ;;  %v1872_v20 = vmax.f32 %v1871_v12, %v1546_v5 }
 0x392   : > { %v1435_v22 = vpop.f32.mrf.mxu1  ;;  %v1548_v23 = vpop.f32.mrf.mxu0 }
 0x393   : > { %v1810_v24 = vmax.f32 %v1809_v15, %v1435_v22  ;;  %v1852_v25 = vmax.f32 %v1851_v17, %v1548_v23  ;;  %v1984_v22 = vshrl.u32 %v1983_v7, 7 }
 0x394   : > { %v1437_v26 = vpop.f32.mrf.mxu1  ;;  %v1550_v27 = vpop.f32.mrf.mxu0 }
 0x395   : > { %v1831_v21 = vmax.f32 %v1830_v19, %v1437_v26  ;;  %v1873_v28 = vmax.f32 %v1872_v20, %v1550_v27  ;;  %v1982_v20 = vunpack.c.0.s8 %v1981_v6 }
 0x396   : > { %v1441_v29 = vpop.f32.mrf.mxu1  ;;  %v1554_v31 = vpop.f32.mrf.mxu0 }
 0x397   : > { %v1811_v32 = vmax.f32 %v1810_v24, %v1441_v29  ;;  %v1853_v33 = vmax.f32 %v1852_v25, %v1554_v31 }
 0x398   : > { %v1443_v34 = vpop.f32.mrf.mxu1  ;;  %v1556_v35 = vpop.f32.mrf.mxu0 }
 0x399   : > { %v1832_v36 = vmax.f32 %v1831_v21, %v1443_v34  ;;  %v1874_v37 = vmax.f32 %v1873_v28, %v1556_v35 }
 0x39a   : > { %v1445_v39 = vpop.f32.mrf.mxu1  ;;  %v1558_v40 = vpop.f32.mrf.mxu0 }
 0x39b   : > { %v1812_v41 = vmax.f32 %v1811_v32, %v1445_v39  ;;  %v1854_v42 = vmax.f32 %v1853_v33, %v1558_v40  ;;  %v2934_v33 = vsub.s32 %v1982_v20, %v1984_v22 }
 0x39c   : > { %v1447_v43 = vpop.f32.mrf.mxu1  ;;  %v1560_v44 = vpop.f32.mrf.mxu0 }
 0x39d   : > { %v1833_v45 = vmax.f32 %v1832_v36, %v1447_v43  ;;  %v1875_v46 = vmax.f32 %v1874_v37, %v1560_v44 }
 0x39e   : > { %v1451_v47 = vpop.f32.mrf.mxu1  ;;  %v1564_v48 = vpop.f32.mrf.mxu0 }
 0x39f   : > { %v1813_v49 = vmax.f32 %v1812_v41, %v1451_v47  ;;  %v1855_v50 = vmax.f32 %v1854_v42, %v1564_v48 }
 0x3a0   : > { %v1453_v51 = vpop.f32.mrf.mxu1  ;;  %v1566_v53 = vpop.f32.mrf.mxu0 }
 0x3a1   : > { %v1834_v38 = vmax.f32 %v1833_v45, %v1453_v51  ;;  %v1876_v55 = vmax.f32 %v1875_v46, %v1566_v53 }
 0x3a2   : > { %v1455_v56 = vpop.f32.mrf.mxu1  ;;  %v1568_v57 = vpop.f32.mrf.mxu0 }
 0x3a3   : > { %v1814_v58 = vmax.f32 %v1813_v49, %v1455_v56  ;;  %v1856_v59 = vmax.f32 %v1855_v50, %v1568_v57 }
 0x3a4   : > { %v1457_v54 = vpop.f32.mrf.mxu1  ;;  %v1570_v60 = vpop.f32.mrf.mxu0 }
 0x3a5   : > { %v1815_v61 = vrot.slane %v1814_v58, 4  ;;  %v1857_v62 = vrot.slane %v1856_v59, 4  ;;  %v1835_v63 = vmax.f32 %v1834_v38, %v1457_v54  ;;  %v1877_v0 = vmax.f32 %v1876_v55, %v1570_v60 }
 0x3a6   : > { %v2926_v1 = vpop.f32.mrf.mxu1  ;;  %v2928_v2 = vpop.f32.mrf.mxu0 }
 0x3a7   : > { %v1816_v16 = vmax.f32 %v1814_v58, %v1815_v61  ;;  %v1858_v30 = vmax.f32 %v1856_v59, %v1857_v62  ;;  %v1836_v52 = vrot.slane %v1835_v63, 4  ;;  %v1878_v3 = vrot.slane %v1877_v0, 4 }
 0x3a8   : > { %v2930_v8 = vpop.f32.mrf.mxu1  ;;  %v2932_v9 = vpop.f32.mrf.mxu0 }
 0x3a9   : > { %v1817_v10 = vrot.slane %v1816_v16, 2  ;;  %v1859_v11 = vrot.slane %v1858_v30, 2  ;;  %v1837_v12 = vmax.f32 %v1835_v63, %v1836_v52  ;;  %v1879_v13 = vmax.f32 %v1877_v0, %v1878_v3 }
 0x3aa   : > { %v1611_v14 = vpop.f32.mrf.mxu1  ;;  %v1724_v15 = vpop.f32.mrf.mxu0 }
 0x3ab   : > { %v1818_v17 = vmax.f32 %v1816_v16, %v1817_v10  ;;  %v1860_v18 = vmax.f32 %v1858_v30, %v1859_v11  ;;  %v1838_v5 = vrot.slane %v1837_v12, 2  ;;  %v1880_v19 = vrot.slane %v1879_v13, 2 }
 0x3ac   : > { %v1613_v23 = vpop.f32.mrf.mxu1  ;;  %v1726_v24 = vpop.f32.mrf.mxu0  ;;  %v1884_v3 = vmax.f32 %v2926_v1, %v1611_v14  ;;  %v1926_v4 = vmax.f32 %v2928_v2, %v1724_v15 }
 0x3ad   : > { %v1819_v25 = vrot.slane %v1818_v17, 1  ;;  %v1861_v26 = vrot.slane %v1860_v18, 1  ;;  %v1839_v27 = vmax.f32 %v1837_v12, %v1838_v5  ;;  %v1881_v21 = vmax.f32 %v1879_v13, %v1880_v19 }
 0x3ae   : > { %v1617_v28 = vpop.f32.mrf.mxu1  ;;  %v1730_v29 = vpop.f32.mrf.mxu0  ;;  %v1905_v10 = vmax.f32 %v2930_v8, %v1613_v23  ;;  %v1947_v11 = vmax.f32 %v2932_v9, %v1726_v24 }
 0x3af   : > { %v1840_v31 = vrot.slane %v1839_v27, 1  ;;  %v1882_v32 = vrot.slane %v1881_v21, 1  ;;  %v1820_v36 = vmax.f32 %v1818_v17, %v1819_v25  ;;  %v1862_v37 = vmax.f32 %v1860_v18, %v1861_v26 }
 0x3b0   : > { %v1619_v34 = vpop.f32.mrf.mxu1  ;;  %v1732_v35 = vpop.f32.mrf.mxu0  ;;  %v1885_v12 = vmax.f32 %v1884_v3, %v1617_v28  ;;  %v1927_v13 = vmax.f32 %v1926_v4, %v1730_v29 }
 0x3b1   : > { %v1841_v39 = vmax.f32 %v1839_v27, %v1840_v31  ;;  %v1883_v40 = vmax.f32 %v1881_v21, %v1882_v32  ;;  %v1906_v5 = vmax.f32 %v1905_v10, %v1619_v34  ;;  %v1948_v19 = vmax.f32 %v1947_v11, %v1732_v35 }
 0x3b2   : > { %v1621_v41 = vpop.f32.mrf.mxu1  ;;  %v1734_v42 = vpop.f32.mrf.mxu0 }
 0x3b3   : > { %v1976_v43 = vcombine.low %v1820_v36, %v1841_v39  ;;  %v1977_v44 = vcombine.low %v1862_v37, %v1883_v40  ;;  %v1886_v20 = vmax.f32 %v1885_v12, %v1621_v41  ;;  %v1928_v22 = vmax.f32 %v1927_v13, %v1734_v42 }
 0x3b4   : > { %v1623_v45 = vpop.f32.mrf.mxu1  ;;  %v1736_v46 = vpop.f32.mrf.mxu0 }
 0x3b5   : > { %v2937_v47 = vrot.slane %v1976_v43, %v2934_v33  ;;  %v2940_v48 = vrot.slane %v1977_v44, %v2934_v33  ;;  %v1907_v27 = vmax.f32 %v1906_v5, %v1623_v45  ;;  %v1949_v1 = vmax.f32 %v1948_v19, %v1736_v46 }
 0x3b6   : > { %v1627_v49 = vpop.f32.mrf.mxu1  ;;  %v1740_v50 = vpop.f32.mrf.mxu0 }
 0x3b7   : > { %v2008_v51 = vcombine.low %v2937_v47, %v2940_v48  ;;  %v1887_v14 = vmax.f32 %v1886_v20, %v1627_v49  ;;  %v1929_v2 = vmax.f32 %v1928_v22, %v1740_v50 }
 0x3b8   : > { %v1629_v53 = vpop.f32.mrf.mxu1  ;;  %v1742_v38 = vpop.f32.mrf.mxu0 }
 0x3b9   : > { %v1908_v31 = vmax.f32 %v1907_v27, %v1629_v53  ;;  %v1950_v8 = vmax.f32 %v1949_v1, %v1742_v38 }
 0x3ba   : > { %v1631_v55 = vpop.f32.mrf.mxu1  ;;  %v1744_v56 = vpop.f32.mrf.mxu0 }
 0x3bb   : > { %v1888_v23 = vmax.f32 %v1887_v14, %v1631_v55  ;;  %v1930_v9 = vmax.f32 %v1929_v2, %v1744_v56 }
 0x3bc   : > { %v1633_v57 = vpop.f32.mrf.mxu1  ;;  %v1746_v58 = vpop.f32.mrf.mxu0 }
 0x3bd   : > { %v1909_v29 = vmax.f32 %v1908_v31, %v1633_v57  ;;  %v1951_v32 = vmax.f32 %v1950_v8, %v1746_v58 }
 0x3be   : > { %v1637_v59 = vpop.f32.mrf.mxu1  ;;  %v1750_v54 = vpop.f32.mrf.mxu0 }
 0x3bf   : > { %v1889_v34 = vmax.f32 %v1888_v23, %v1637_v59  ;;  %v1931_v35 = vmax.f32 %v1930_v9, %v1750_v54 }
 0x3c0   : > { %v1639_v60 = vpop.f32.mrf.mxu1  ;;  %v1752_v61 = vpop.f32.mrf.mxu0 }
 0x3c1   : > { %v1910_v39 = vmax.f32 %v1909_v29, %v1639_v60  ;;  %v1952_v40 = vmax.f32 %v1951_v32, %v1752_v61 }
 0x3c2   : > { %v1641_v62 = vpop.f32.mrf.mxu1  ;;  %v1754_v63 = vpop.f32.mrf.mxu0 }
 0x3c3   : > { %v1890_v41 = vmax.f32 %v1889_v34, %v1641_v62  ;;  %v1932_v42 = vmax.f32 %v1931_v35, %v1754_v63 }
 0x3c4   : > { %v1643_v0 = vpop.f32.mrf.mxu1  ;;  %v1756_v16 = vpop.f32.mrf.mxu0 }
 0x3c5   : > { %v1911_v45 = vmax.f32 %v1910_v39, %v1643_v0  ;;  %v1953_v46 = vmax.f32 %v1952_v40, %v1756_v16 }
 0x3c6   : > { %v1647_v30 = vpop.f32.mrf.mxu1  ;;  %v1760_v52 = vpop.f32.mrf.mxu0 }
 0x3c7   : > { %v1891_v49 = vmax.f32 %v1890_v41, %v1647_v30  ;;  %v1933_v50 = vmax.f32 %v1932_v42, %v1760_v52 }
 0x3c8   : > { %v1649_v6 = vpop.f32.mrf.mxu1  ;;  %v1762_v7 = vpop.f32.mrf.mxu0 }
 0x3c9   : > { %v1912_v55 = vmax.f32 %v1911_v45, %v1649_v6  ;;  %v1954_v56 = vmax.f32 %v1953_v46, %v1762_v7 }
 0x3ca   : > { %v1651_v17 = vpop.f32.mrf.mxu1  ;;  %v1764_v18 = vpop.f32.mrf.mxu0 }
 0x3cb   : > { %v1892_v57 = vmax.f32 %v1891_v49, %v1651_v17  ;;  %v1934_v58 = vmax.f32 %v1933_v50, %v1764_v18 }
 0x3cc   : > { %v1653_v25 = vpop.f32.mrf.mxu1  ;;  %v1766_v26 = vpop.f32.mrf.mxu0 }
 0x3cd   : > { %v1913_v3 = vmax.f32 %v1912_v55, %v1653_v25  ;;  %v1955_v4 = vmax.f32 %v1954_v56, %v1766_v26 }
 0x3ce   : > { %v1657_v15 = vpop.f32.mrf.mxu1  ;;  %v1770_v21 = vpop.f32.mrf.mxu0 }
 0x3cf   : > { %v1893_v60 = vmax.f32 %v1892_v57, %v1657_v15  ;;  %v1935_v61 = vmax.f32 %v1934_v58, %v1770_v21 }
 0x3d0   : > { %v1659_v24 = vpop.f32.mrf.mxu1  ;;  %v1772_v28 = vpop.f32.mrf.mxu0 }
 0x3d1   : > { %v1914_v10 = vmax.f32 %v1913_v3, %v1659_v24  ;;  %v1956_v11 = vmax.f32 %v1955_v4, %v1772_v28 }
 0x3d2   : > { %v1661_v36 = vpop.f32.mrf.mxu1  ;;  %v1774_v37 = vpop.f32.mrf.mxu0 }
 0x3d3   : > { %v1894_v0 = vmax.f32 %v1893_v60, %v1661_v36  ;;  %v1936_v16 = vmax.f32 %v1935_v61, %v1774_v37 }
 0x3d4   : > { %v1663_v43 = vpop.f32.mrf.mxu1  ;;  %v1776_v44 = vpop.f32.mrf.mxu0 }
 0x3d5   : > { %v1915_v12 = vmax.f32 %v1914_v10, %v1663_v43  ;;  %v1957_v13 = vmax.f32 %v1956_v11, %v1776_v44  ;;  %v2016_v11 = vrot.slane %v2008_v51, %v2934_v33 }
 0x3d6   : > { %v1667_v53 = vpop.f32.mrf.mxu1  ;;  %v1780_v38 = vpop.f32.mrf.mxu0 }
 0x3d7   : > { %v1895_v6 = vmax.f32 %v1894_v0, %v1667_v53  ;;  %v1937_v7 = vmax.f32 %v1936_v16, %v1780_v38  ;;  %v1799_v16 = vld [vmem:[#allocation2] sm:$0xff] }
 0x3d8   : > { %v1669_v59 = vpop.f32.mrf.mxu1  ;;  %v1782_v54 = vpop.f32.mrf.mxu0 }
 0x3d9   : > { %v1916_v5 = vmax.f32 %v1915_v12, %v1669_v59  ;;  %v1958_v19 = vmax.f32 %v1957_v13, %v1782_v54 }
 0x3da   : > { %v1671_v62 = vpop.f32.mrf.mxu1  ;;  %v1784_v63 = vpop.f32.mrf.mxu0 }
 0x3db   : > { %v1896_v20 = vmax.f32 %v1895_v6, %v1671_v62  ;;  %v1938_v22 = vmax.f32 %v1937_v7, %v1784_v63 }
 0x3dc   : > { %v1673_v30 = vpop.f32.mrf.mxu1  ;;  %v1786_v52 = vpop.f32.mrf.mxu0 }
 0x3dd   : > { %v1917_v27 = vmax.f32 %v1916_v5, %v1673_v30  ;;  %v1959_v1 = vmax.f32 %v1958_v19, %v1786_v52 }
 0x3de   : > { %v1677_v17 = vpop.f32.mrf.mxu1  ;;  %v1790_v18 = vpop.f32.mrf.mxu0 }
 0x3df   : > { %v1897_v14 = vmax.f32 %v1896_v20, %v1677_v17  ;;  %v1939_v2 = vmax.f32 %v1938_v22, %v1790_v18 }
 0x3e0   : > { %v1679_v25 = vpop.f32.mrf.mxu1  ;;  %v1792_v26 = vpop.f32.mrf.mxu0 }
 0x3e1   : > { %v1918_v31 = vmax.f32 %v1917_v27, %v1679_v25  ;;  %v1960_v8 = vmax.f32 %v1959_v1, %v1792_v26 }
 0x3e2   : > { %v1681_v15 = vpop.f32.mrf.mxu1  ;;  %v1794_v21 = vpop.f32.mrf.mxu0 }
 0x3e3   : > { %v1898_v23 = vmax.f32 %v1897_v14, %v1681_v15  ;;  %v1940_v9 = vmax.f32 %v1939_v2, %v1794_v21 }
 0x3e4   : > { %v1683_v24 = vpop.f32.mrf.mxu1  ;;  %v1796_v28 = vpop.f32.mrf.mxu0 }
 0x3e5   : > { %v1899_v29 = vrot.slane %v1898_v23, 4  ;;  %v1941_v32 = vrot.slane %v1940_v9, 4  ;;  %v1919_v34 = vmax.f32 %v1918_v31, %v1683_v24  ;;  %v1961_v35 = vmax.f32 %v1960_v8, %v1796_v28 }
 0x3e7   : > { %v1900_v36 = vmax.f32 %v1898_v23, %v1899_v29  ;;  %v1942_v37 = vmax.f32 %v1940_v9, %v1941_v32  ;;  %v1920_v39 = vrot.slane %v1919_v34, 4  ;;  %v1962_v40 = vrot.slane %v1961_v35, 4 }
 0x3e9   : > { %v1901_v41 = vrot.slane %v1900_v36, 2  ;;  %v1943_v42 = vrot.slane %v1942_v37, 2  ;;  %v1921_v43 = vmax.f32 %v1919_v34, %v1920_v39  ;;  %v1963_v44 = vmax.f32 %v1961_v35, %v1962_v40 }
 0x3eb   : > { %v1902_v45 = vmax.f32 %v1900_v36, %v1901_v41  ;;  %v1944_v46 = vmax.f32 %v1942_v37, %v1943_v42  ;;  %v1922_v49 = vrot.slane %v1921_v43, 2  ;;  %v1964_v50 = vrot.slane %v1963_v44, 2 }
 0x3ed   : > { %v1903_v53 = vrot.slane %v1902_v45, 1  ;;  %v1945_v38 = vrot.slane %v1944_v46, 1  ;;  %v1923_v55 = vmax.f32 %v1921_v43, %v1922_v49  ;;  %v1965_v56 = vmax.f32 %v1963_v44, %v1964_v50 }
 0x3ef   : > { %v1924_v57 = vrot.slane %v1923_v55, 1  ;;  %v1966_v58 = vrot.slane %v1965_v56, 1  ;;  %v1904_v59 = vmax.f32 %v1902_v45, %v1903_v53  ;;  %v1946_v54 = vmax.f32 %v1944_v46, %v1945_v38 }
 0x3f1   : > { %v1925_v3 = vmax.f32 %v1923_v55, %v1924_v57  ;;  %v1967_v4 = vmax.f32 %v1965_v56, %v1966_v58 }
 0x3f3   : > { %v1978_v60 = vcombine.low %v1904_v59, %v1925_v3  ;;  %v1979_v61 = vcombine.low %v1946_v54, %v1967_v4 }
 0x3f5   : > { %v2000_v62 = vrot.slane %v1978_v60, %v2934_v33  ;;  %v2007_v63 = vrot.slane %v1979_v61, %v2934_v33 }
 0x3f7   : > { %v2009_v10 = vcombine.low %v2000_v62, %v2007_v63 }
 0x3f9   : > { %v2023_v0 = vrot.slane %v2009_v10, %v2934_v33 }
 0x3fb   : > { %v2024_v30 = vcombine.low %v2016_v11, %v2023_v0  ;;  %2031 = sbr.rel (%p2259_p13) target bundleno = 1036 (0x40c), region = 68 }
 0x3fd   : > { %v2026_v52 = vmax.f32 %v1799_v16, %v2024_v30 }
 0x3ff   : > { %2027 = vst [vmem:[#allocation2] sm:$0xff] %v2026_v52 }
 0x400   : > { %v2033_v13 = vld [vmem:[%s3017_s8] sm:$0xff] }
 0x406   : > { %v2032_v12 = vld [vmem:[#allocation2] sm:$0xff] }
 0x407   : > { %v2034_v6 = vadd.f32 %v2033_v13, %v2032_v12 }
 0x409   : > { %v2035_v7 = vmax.f32 %v2034_v6, 0.0 }
 0x40b   : > { %2036 = vst [vmem:[%s363_s7] sm:$0xff] %v2035_v7 }
 0x40c PF: > { %s2265_s24 = sshll.u32 %s2582_s13, 7  ;;  %s2052_s26 = sshll.u32 %s363_s7, 4  ;;  %s2053_s26 = int_to_ptr.vmem [resolvable:$true] %s2052_s26 }
 0x40d   : > { %s2050_s12 = scalar_lea.hbm %s3018_s9, %s2265_s24  ;;  %s3032_s21 = sand.u32 1, %s2570_s10  }
 0x40e   : > { %s2038_s28 = scalar_lea.sflag [#allocation5], %s3032_s21  ;;  %s2498_s15 = scalar_lea.vmem %s2053_s26, 128 }
 0x40f   : > { %p2499_p1 = scmp.ne.s32.totalorder %s2053_s26, %s2498_s15  ;;  %s2602_s25 = smov [#allocation6]  }
 0x410   : > { %s2502_s18 = sshll.u32 %s2602_s25, 4  ;;  %s2503_s18 = int_to_ptr.vmem [resolvable:$false] %s2502_s18 }
 0x411   : > { %p2500_p2 = pnand %p2499_p1, %p2703_p3  ;;  %s2504_s20 = scalar_lea.vmem %s2503_s18, 256 }
 0x412   : > { %p2505_p5 = scmp.lt.s32.totalorder %s2053_s26, %s2503_s18  ;;  %p2506_p6 = scmp.lt.s32.totalorder %s2504_s20, %s2498_s15 }
 0x413   : > { %p2501_p4 = pneg %p2500_p2 }
 0x414   : > { %p2507_p7 = por %p2506_p6, %p2505_p5 }
 0x416   : > { %p2508_p8 = pnand %p2507_p7, %p2501_p4 }
 0x418   : > { %2511 = shalt.err (!%p2508_p8)
}
 0x419   : > { %s2512_s13 = scalar_lea.hbm %s2050_s12, 128  ;;  %s2516_s24 = scalar_lea.hbm %s3018_s9, 256 }
 0x41a   : > { %p2513_p11 = scmp.ne.s32.totalorder %s2050_s12, %s2512_s13  ;;  %p2517_p10 = scmp.lt.s32.totalorder %s2050_s12, %s3018_s9 }
 0x41b   : > { %p2518_p13 = scmp.lt.s32.totalorder %s2516_s24, %s2512_s13 }
 0x41c   : > { %p2514_p12 = pnand %p2513_p11, %p2703_p3 }
 0x41d   : > { %p2519_p1 = por %p2518_p13, %p2517_p10 }
 0x41e   : > { %p2515_p0 = pneg %p2514_p12 }
 0x420   : > { %p2520_p2 = pnand %p2519_p1, %p2515_p0 }
 0x422   : > { %2523 = shalt.err (!%p2520_p2)
}
 0x423   : > { %2373 = dma.vmem_to_hbm [thread:$0]  (%p2703_p3), %s2053_s26, 128, %s2050_s12, %s2038_s28  }
 0x424 PF: > { %p2385_p4 = scmp.ge.s32.totalorder %s2594_s16, 2  ;;  %s2064_s21 = sand.u32 1, %s2566_s30  }
 0x425   : > { %s2065_s15 = scalar_lea.sflag [#allocation5], %s2064_s21 }
 0x426   : > { %p2380_p5 = pnand %p2385_p4, %p2713_p9 }
 0x428   : > { %p2381_p6 = pneg %p2380_p5 }
 0x42a   : > { %2561 = dma.done.wait (%p2381_p6), %s2065_s15, 128  }
 0x42b   : > { %2563 = vsyncadd (%p2381_p6), %s2065_s15, 4294967168  ;;  %s23_s16 = sadd.s32 1, %s2594_s16   ;;  %s3033_s13 = sld [smem:[#allocation9_spill]] }
 0x42c   : > { %p20_p7 = scmp.ge.s32.totalorder %s23_s16, 6   ;;  %s3034_s22 = sld [smem:[#allocation10_spill]] }
 0x42d   : > { %s3035_s15 = sld [smem:[#allocation11_spill]]  ;;  %s3036_s30 = smov %s2570_s10 }
 0x42e   : > { %s3037_s10 = smov %s2574_s11  ;;  %s3038_s11 = smov %s2730_s27 }
 0x42f   : > { %s3039_s12 = smov %s2586_s14  ;;  %22 = sbr.rel (!%p20_p7) target bundleno = 8 (0x8), region = 104 }
 0x432   : > { %s3040_s14 = smov %s3034_s22 }
 0x434   :  { %2070 = vsyncpa [#allocation4], 1 }
 0x435   :  { %2072 = vsyncpa [#allocation4 + $0x1], 1 }
 0x436   :  { %2073 = vsyncpa [#allocation5], 1 }
 0x437   :  { %2075 = vsyncpa [#allocation5 + $0x1], 1 }

</bundles_post_ra>
